<compile_context>
chip_gen: v7x
topology: tpu7x:2x2x1
jax: 0.10.0
libtpu: 0.0.40
codegen_flags: <defaults>
</compile_context>

<pallas_src>
import functools

import jax
import jax.numpy as jnp
from jax import lax
from jax.experimental import pallas as pl
from jax.experimental.pallas import tpu as pltpu

LANE = 128  # lane-dense padding width for the fc head


def _round_up(n, m):
    return ((n + m - 1) // m) * m


# ---------------------------------------------------------------------------
# Fused kernel builder: all LSTM layers + fc1/ReLU/fc2 head in one kernel.
# refs = (x2d, [wih_t, whh_t, bias] * L, fc1_wt, fc1_b, fc2_wt, fc2_b,
#         out, seq_scr, gates_scr)
# ---------------------------------------------------------------------------
def _build_fused_kernel(*, num_layers, T, Bp, H):
    G = 4 * H

    def kernel(*refs):
        x_ref = refs[0]
        layer_refs = refs[1:1 + 3 * num_layers]
        fc1_w_ref, fc1_b_ref, fc2_w_ref, fc2_b_ref = refs[1 + 3 * num_layers:5 + 3 * num_layers]
        out_ref = refs[5 + 3 * num_layers]
        seq_scr, gates_scr = refs[6 + 3 * num_layers:]

        # Hoisted lane-mask constants: sigmoid(x) = 0.5*tanh(0.5*x) + 0.5 on i/f/o lanes,
        # tanh(x) on g lanes -> one full-vreg tanh per step instead of 4 narrow EUP calls.
        lane = lax.broadcasted_iota(jnp.int32, (Bp, G), 1)
        is_g = (lane >= 2 * H) & (lane < 3 * H)
        pre_scale = jnp.where(is_g, 1.0, 0.5).astype(jnp.float32)
        post_scale = pre_scale
        post_off = jnp.where(is_g, 0.0, 0.5).astype(jnp.float32)

        h_last = jnp.zeros((Bp, H), jnp.float32)
        for layer in range(num_layers):
            wih_ref = layer_refs[3 * layer + 0]
            whh_ref = layer_refs[3 * layer + 1]
            b_ref = layer_refs[3 * layer + 2]
            last_layer = layer == num_layers - 1

            # ---- hoisted input projection for ALL timesteps (one bf16 matmul, bias folded) ----
            inp = x_ref[...] if layer == 0 else seq_scr[...]           # bf16 (T*Bp, D_in)
            gates_scr[...] = (
                jnp.dot(inp, wih_ref[...], preferred_element_type=jnp.float32)
                + b_ref[...]
            )                                                          # f32 (T*Bp, 4H)

            whh = whh_ref[...]                                         # bf16 (H, 4H), loaded once

            def step(t, carry, *, _whh=whh, _last=last_layer):
                h, c = carry                                           # f32 vreg carries
                start = pl.multiple_of(t * Bp, Bp)
                g = gates_scr[pl.ds(start, Bp), :] + jnp.dot(
                    h.astype(jnp.bfloat16), _whh, preferred_element_type=jnp.float32)
                act = jnp.tanh(g * pre_scale) * post_scale + post_off  # [sig,sig,tanh,sig]
                i_g = act[:, 0 * H:1 * H]
                f_g = act[:, 1 * H:2 * H]
                g_g = act[:, 2 * H:3 * H]
                o_g = act[:, 3 * H:4 * H]
                c_new = f_g * c + i_g * g_g
                h_new = o_g * jnp.tanh(c_new)
                if not _last:
                    # Only intermediate layers need the full hidden sequence (bf16 operand
                    # for the next layer's hoisted projection).
                    seq_scr[pl.ds(start, Bp), :] = h_new.astype(jnp.bfloat16)
                return (h_new, c_new)

            zeros = jnp.zeros((Bp, H), jnp.float32)
            h_last, _ = lax.fori_loop(0, T, step, (zeros, zeros), unroll=True)

        # ---- fused MLP head (Dropout == identity in eval mode), lane-dense (Bp, 128) ----
        z = jnp.dot(h_last.astype(jnp.bfloat16), fc1_w_ref[...],
                    preferred_element_type=jnp.float32) + fc1_b_ref[...]
        z = jnp.maximum(z, 0.0)
        out_ref[...] = (
            jnp.dot(z.astype(jnp.bfloat16), fc2_w_ref[...],
                    preferred_element_type=jnp.float32) + fc2_b_ref[...]
        )

    return kernel


def _fused_forward(packed, x2d, *, num_layers, T, Bp, B, H, in_dim, out_dim):
    kernel = _build_fused_kernel(num_layers=num_layers, T=T, Bp=Bp, H=H)

    inputs = [x2d]
    for lp in packed["lstm"]:
        inputs += [lp["wih_t"], lp["whh_t"], lp["bias"]]
    inputs += [packed["fc1_wt"], packed["fc1_b"], packed["fc2_wt"], packed["fc2_b"]]

    vmem = pl.BlockSpec(memory_space=pltpu.MemorySpace.VMEM)

    # Advisory cost estimate for the XLA scheduler.
    flops = 0
    d_in = in_dim
    for _ in range(num_layers):
        flops += 2 * T * Bp * d_in * 4 * H          # hoisted input projection
        flops += 2 * T * Bp * H * 4 * H             # recurrent projection
        d_in = H
    flops += 2 * Bp * H * LANE + 2 * Bp * LANE * LANE
    transcendentals = num_layers * T * Bp * (4 * H + H)
    bytes_accessed = sum(int(a.size) * a.dtype.itemsize for a in inputs) + Bp * LANE * 4

    out = pl.pallas_call(
        kernel,
        out_shape=jax.ShapeDtypeStruct((Bp, LANE), jnp.float32),
        in_specs=[vmem] * len(inputs),
        out_specs=vmem,
        scratch_shapes=[
            pltpu.VMEM((T * Bp, H), jnp.bfloat16),       # inter-layer hidden sequence (bf16)
            pltpu.VMEM((T * Bp, 4 * H), jnp.float32),    # hoisted input-gate projections
        ],
        compiler_params=pltpu.CompilerParams(vmem_limit_bytes=32 * 1024 * 1024),
        cost_estimate=pl.CostEstimate(
            flops=flops, transcendentals=transcendentals, bytes_accessed=bytes_accessed),
    )(*inputs)
    return out[:B, :out_dim]


# ---------------------------------------------------------------------------
# Parameters (PyTorch layout) + one-time packing into kernel-friendly layout.
# ---------------------------------------------------------------------------
def init_params(key, input_size, hidden_size, num_layers, output_size):
    params = {"lstm": []}
    k = key
    std = 1.0 / jnp.sqrt(hidden_size)
    for layer in range(num_layers):
        d_in = input_size if layer == 0 else hidden_size
        k, k1, k2, k3, k4 = jax.random.split(k, 5)
        params["lstm"].append({
            "w_ih": jax.random.uniform(k1, (4 * hidden_size, d_in), jnp.float32, -std, std),
            "w_hh": jax.random.uniform(k2, (4 * hidden_size, hidden_size), jnp.float32, -std, std),
            "b_ih": jax.random.uniform(k3, (4 * hidden_size,), jnp.float32, -std, std),
            "b_hh": jax.random.uniform(k4, (4 * hidden_size,), jnp.float32, -std, std),
        })
    half = hidden_size // 2
    k, k1, k2, k3, k4 = jax.random.split(k, 5)
    s1 = 1.0 / jnp.sqrt(hidden_size)
    s2 = 1.0 / jnp.sqrt(half)
    params["fc1_w"] = jax.random.uniform(k1, (half, hidden_size), jnp.float32, -s1, s1)
    params["fc1_b"] = jax.random.uniform(k2, (half,), jnp.float32, -s1, s1)
    params["fc2_w"] = jax.random.uniform(k3, (output_size, half), jnp.float32, -s2, s2)
    params["fc2_b"] = jax.random.uniform(k4, (output_size,), jnp.float32, -s2, s2)
    return params


def pack_params(params):
    """One-time weight packing: transpose, bias folding, bf16 cast, lane-dense fc padding."""
    packed = {"lstm": []}
    for lp in params["lstm"]:
        packed["lstm"].append({
            "wih_t": jnp.transpose(lp["w_ih"]).astype(jnp.bfloat16),        # (D_in, 4H) bf16
            "whh_t": jnp.transpose(lp["w_hh"]).astype(jnp.bfloat16),        # (H, 4H)    bf16
            "bias": (lp["b_ih"] + lp["b_hh"]).reshape(1, -1).astype(jnp.float32),
        })
    half, H = params["fc1_w"].shape
    O = params["fc2_w"].shape[0]
    # Zero-pad the head to 128 output lanes: padded fc1 columns stay exactly 0 through
    # ReLU, padded fc2 rows/columns are 0, so the wrapper slice [:, :O] is exact.
    fc1_wt = jnp.zeros((H, LANE), jnp.float32).at[:, :half].set(jnp.transpose(params["fc1_w"]))
    fc1_b = jnp.zeros((1, LANE), jnp.float32).at[0, :half].set(params["fc1_b"])
    fc2_wt = jnp.zeros((LANE, LANE), jnp.float32).at[:half, :O].set(jnp.transpose(params["fc2_w"]))
    fc2_b = jnp.zeros((1, LANE), jnp.float32).at[0, :O].set(params["fc2_b"])
    packed["fc1_wt"] = fc1_wt.astype(jnp.bfloat16)   # (H, 128)   bf16
    packed["fc1_b"] = fc1_b                          # (1, 128)   f32
    packed["fc2_wt"] = fc2_wt.astype(jnp.bfloat16)   # (128, 128) bf16
    packed["fc2_b"] = fc2_b                          # (1, 128)   f32
    return packed


@functools.partial(jax.jit, static_argnames=("out_dim",))
def lstm_model_forward(packed, x, *, out_dim):
    """x: (B, T, input_size) batch_first, as in the PyTorch module."""
    num_layers = len(packed["lstm"])
    H = packed["lstm"][0]["whh_t"].shape[0]
    B, T, D = x.shape
    Bp = _round_up(max(B, 16), 16)                              # pad to bf16 sublane multiple
    x_tbd = jnp.transpose(x, (1, 0, 2)).astype(jnp.float32)     # (T, B, D)
    x_tbd = jnp.pad(x_tbd, ((0, 0), (0, Bp - B), (0, 0)))       # (T, Bp, D)
    x2d = x_tbd.reshape(T * Bp, D).astype(jnp.bfloat16)         # bf16 MXU operand
    # TODO(synk): Dropout is identity here (eval mode); train-mode dropout not implemented.
    return _fused_forward(packed, x2d, num_layers=num_layers, T=T, Bp=Bp, B=B,
                          H=H, in_dim=D, out_dim=out_dim)


# ---------------------------------------------------------------------------
# Pure-JAX f32 reference (PyTorch eval-mode semantics) for a correctness check.
# ---------------------------------------------------------------------------
def reference_forward(params, x):
    x_tbd = jnp.transpose(x, (1, 0, 2)).astype(jnp.float32)
    h_seq = x_tbd
    for lp in params["lstm"]:
        Tt, Bb, _ = h_seq.shape
        H = lp["w_hh"].shape[1]

        def step(carry, x_t, _lp=lp, _H=H):
            h, c = carry
            gates = x_t @ _lp["w_ih"].T + h @ _lp["w_hh"].T + _lp["b_ih"] + _lp["b_hh"]
            i = jax.nn.sigmoid(gates[:, 0 * _H:1 * _H])
            f = jax.nn.sigmoid(gates[:, 1 * _H:2 * _H])
            g = jnp.tanh(gates[:, 2 * _H:3 * _H])
            o = jax.nn.sigmoid(gates[:, 3 * _H:4 * _H])
            c = f * c + i * g
            h = o * jnp.tanh(c)
            return (h, c), h

        init = (jnp.zeros((Bb, H), jnp.float32), jnp.zeros((Bb, H), jnp.float32))
        _, hs = lax.scan(step, init, h_seq)
        h_seq = hs
    h_last = h_seq[-1]
    z = jnp.maximum(h_last @ params["fc1_w"].T + params["fc1_b"], 0.0)
    return z @ params["fc2_w"].T + params["fc2_b"]


if __name__ == "__main__":
    INPUT_SIZE = 16
    HIDDEN_SIZE = 32
    NUM_LAYERS = 2
    OUTPUT_SIZE = 4
    BATCH = 2
    SEQ = 8

    key = jax.random.PRNGKey(0)
    k_params, k_x = jax.random.split(key)
    params = init_params(k_params, INPUT_SIZE, HIDDEN_SIZE, NUM_LAYERS, OUTPUT_SIZE)
    packed = pack_params(params)
    x = jax.random.normal(k_x, (BATCH, SEQ, INPUT_SIZE), jnp.float32)

    out = lstm_model_forward(packed, x, out_dim=OUTPUT_SIZE)
    out = jax.block_until_ready(out)
    assert out.shape == (BATCH, OUTPUT_SIZE), out.shape

    ref = jax.block_until_ready(reference_forward(params, x))
    # Tolerance covers bf16 MXU operands (f32 accumulation) vs. the all-f32 reference.
    assert jnp.allclose(out, ref, rtol=2e-2, atol=2e-2), (out, ref)

    print("KERNEL_OK")
</pallas_src>

<mosaic_0001>
module attributes {stable_mosaic.version = 11 : i64} {
  func.func @kernel(%arg0: memref<128x16xbf16, #tpu.memory_space<vmem>>, %arg1: memref<16x128xbf16, #tpu.memory_space<vmem>>, %arg2: memref<32x128xbf16, #tpu.memory_space<vmem>>, %arg3: memref<1x128xf32, #tpu.memory_space<vmem>>, %arg4: memref<32x128xbf16, #tpu.memory_space<vmem>>, %arg5: memref<32x128xbf16, #tpu.memory_space<vmem>>, %arg6: memref<1x128xf32, #tpu.memory_space<vmem>>, %arg7: memref<32x128xbf16, #tpu.memory_space<vmem>>, %arg8: memref<1x128xf32, #tpu.memory_space<vmem>>, %arg9: memref<128x128xbf16, #tpu.memory_space<vmem>>, %arg10: memref<1x128xf32, #tpu.memory_space<vmem>>, %arg11: memref<16x128xf32, #tpu.memory_space<vmem>>, %arg12: memref<128x32xbf16, #tpu.memory_space<vmem>>, %arg13: memref<128x128xf32, #tpu.memory_space<vmem>>) attributes {dimension_semantics = [], scalar_prefetch = 0 : i64, scratch_operands = 2 : i64, tpu.core_type = #tpu.core_type<tc>} {
    %0 = tpu.iota {dimensions = array<i32: 1>} : vector<16x128xi32>
    %c64_i32 = arith.constant 64 : i32
    %1 = vector.broadcast %c64_i32 : i32 to vector<16x128xi32>
    %2 = arith.cmpi sge, %0, %1 : vector<16x128xi32>
    %c96_i32 = arith.constant 96 : i32
    %3 = vector.broadcast %c96_i32 : i32 to vector<16x128xi32>
    %4 = arith.cmpi slt, %0, %3 : vector<16x128xi32>
    %5 = arith.andi %2, %4 : vector<16x128xi1>
    %cst = arith.constant 1.000000e+00 : f32
    %cst_0 = arith.constant 5.000000e-01 : f32
    %6 = vector.broadcast %cst : f32 to vector<16x128xf32>
    %7 = vector.broadcast %cst_0 : f32 to vector<16x128xf32>
    %8 = arith.select %5, %6, %7 : vector<16x128xi1>, vector<16x128xf32>
    %cst_1 = arith.constant 0.000000e+00 : f32
    %cst_2 = arith.constant 5.000000e-01 : f32
    %9 = vector.broadcast %cst_1 : f32 to vector<16x128xf32>
    %10 = vector.broadcast %cst_2 : f32 to vector<16x128xf32>
    %11 = arith.select %5, %9, %10 : vector<16x128xi1>, vector<16x128xf32>
    %c0 = arith.constant 0 : index
    %c0_3 = arith.constant 0 : index
    %12 = vector.load %arg0[%c0, %c0_3] : memref<128x16xbf16, #tpu.memory_space<vmem>>, vector<128x16xbf16>
    %c0_4 = arith.constant 0 : index
    %c0_5 = arith.constant 0 : index
    %13 = vector.load %arg1[%c0_4, %c0_5] : memref<16x128xbf16, #tpu.memory_space<vmem>>, vector<16x128xbf16>
    %cst_6 = arith.constant dense<0.000000e+00> : vector<128x128xf32>
    %14 = tpu.matmul %12, %13, %cst_6 {dimension_numbers = #tpu.dot_dimension_numbers<[1], [0], [0], [1], [0, 0, 1, 1], [], []>} : vector<128x16xbf16>, vector<16x128xbf16>, vector<128x128xf32> -> vector<128x128xf32>
    %c0_7 = arith.constant 0 : index
    %c0_8 = arith.constant 0 : index
    %15 = vector.load %arg3[%c0_7, %c0_8] : memref<1x128xf32, #tpu.memory_space<vmem>>, vector<1x128xf32>
    %16 = vector.broadcast %15 : vector<1x128xf32> to vector<128x128xf32>
    %17 = arith.addf %14, %16 : vector<128x128xf32>
    %c0_9 = arith.constant 0 : index
    %c0_10 = arith.constant 0 : index
    %18 = vector.load %arg13[%c0_9, %c0_10] : memref<128x128xf32, #tpu.memory_space<vmem>>, vector<128x128xf32>
    tpu.vector_store %arg13[%c0_9, %c0_10], %17 {strides = array<i32>} : memref<128x128xf32, #tpu.memory_space<vmem>>, vector<128x128xf32>,
    %c0_11 = arith.constant 0 : index
    %c0_12 = arith.constant 0 : index
    %19 = vector.load %arg2[%c0_11, %c0_12] : memref<32x128xbf16, #tpu.memory_space<vmem>>, vector<32x128xbf16>
    %cst_13 = arith.constant 0.000000e+00 : f32
    %20 = vector.broadcast %cst_13 : f32 to vector<16x32xf32>
    %c0_i32 = arith.constant 0 : i32
    %c16_i32 = arith.constant 16 : i32
    %21 = arith.muli %c0_i32, %c16_i32 : i32
    %22 = tpu.assume_multiple %21, 16 : i32
    %23 = arith.index_cast %22 : i32 to index
    %c0_14 = arith.constant 0 : index
    %24 = vector.load %arg13[%23, %c0_14] : memref<128x128xf32, #tpu.memory_space<vmem>>, vector<16x128xf32>
    %25 = arith.truncf %20 : vector<16x32xf32> to vector<16x32xbf16>
    %cst_15 = arith.constant dense<0.000000e+00> : vector<16x128xf32>
    %26 = tpu.matmul %25, %19, %cst_15 {dimension_numbers = #tpu.dot_dimension_numbers<[1], [0], [0], [1], [0, 0, 1, 1], [], []>} : vector<16x32xbf16>, vector<32x128xbf16>, vector<16x128xf32> -> vector<16x128xf32>
    %27 = arith.addf %24, %26 : vector<16x128xf32>
    %28 = arith.mulf %27, %8 : vector<16x128xf32>
    %29 = math.tanh %28 : vector<16x128xf32>
    %30 = arith.mulf %29, %8 : vector<16x128xf32>
    %31 = arith.addf %30, %11 : vector<16x128xf32>
    %32 = vector.extract_strided_slice %31 {offsets = [0, 0], sizes = [16, 32], strides = [1, 1]} : vector<16x128xf32> to vector<16x32xf32>
    %33 = vector.extract_strided_slice %31 {offsets = [0, 32], sizes = [16, 32], strides = [1, 1]} : vector<16x128xf32> to vector<16x32xf32>
    %34 = vector.extract_strided_slice %31 {offsets = [0, 64], sizes = [16, 32], strides = [1, 1]} : vector<16x128xf32> to vector<16x32xf32>
    %35 = vector.extract_strided_slice %31 {offsets = [0, 96], sizes = [16, 32], strides = [1, 1]} : vector<16x128xf32> to vector<16x32xf32>
    %36 = arith.mulf %33, %20 : vector<16x32xf32>
    %37 = arith.mulf %32, %34 : vector<16x32xf32>
    %38 = arith.addf %36, %37 : vector<16x32xf32>
    %39 = math.tanh %38 : vector<16x32xf32>
    %40 = arith.mulf %35, %39 : vector<16x32xf32>
    %41 = arith.truncf %40 : vector<16x32xf32> to vector<16x32xbf16>
    %42 = arith.index_cast %22 : i32 to index
    %c0_16 = arith.constant 0 : index
    %43 = vector.load %arg12[%42, %c0_16] : memref<128x32xbf16, #tpu.memory_space<vmem>>, vector<16x32xbf16>
    tpu.vector_store %arg12[%42, %c0_16], %41 {strides = array<i32>} : memref<128x32xbf16, #tpu.memory_space<vmem>>, vector<16x32xbf16>,
    %c1_i32 = arith.constant 1 : i32
    %c16_i32_17 = arith.constant 16 : i32
    %44 = arith.muli %c1_i32, %c16_i32_17 : i32
    %45 = tpu.assume_multiple %44, 16 : i32
    %46 = arith.index_cast %45 : i32 to index
    %c0_18 = arith.constant 0 : index
    %47 = vector.load %arg13[%46, %c0_18] : memref<128x128xf32, #tpu.memory_space<vmem>>, vector<16x128xf32>
    %48 = arith.truncf %40 : vector<16x32xf32> to vector<16x32xbf16>
    %cst_19 = arith.constant dense<0.000000e+00> : vector<16x128xf32>
    %49 = tpu.matmul %48, %19, %cst_19 {dimension_numbers = #tpu.dot_dimension_numbers<[1], [0], [0], [1], [0, 0, 1, 1], [], []>} : vector<16x32xbf16>, vector<32x128xbf16>, vector<16x128xf32> -> vector<16x128xf32>
    %50 = arith.addf %47, %49 : vector<16x128xf32>
    %51 = arith.mulf %50, %8 : vector<16x128xf32>
    %52 = math.tanh %51 : vector<16x128xf32>
    %53 = arith.mulf %52, %8 : vector<16x128xf32>
    %54 = arith.addf %53, %11 : vector<16x128xf32>
    %55 = vector.extract_strided_slice %54 {offsets = [0, 0], sizes = [16, 32], strides = [1, 1]} : vector<16x128xf32> to vector<16x32xf32>
    %56 = vector.extract_strided_slice %54 {offsets = [0, 32], sizes = [16, 32], strides = [1, 1]} : vector<16x128xf32> to vector<16x32xf32>
    %57 = vector.extract_strided_slice %54 {offsets = [0, 64], sizes = [16, 32], strides = [1, 1]} : vector<16x128xf32> to vector<16x32xf32>
    %58 = vector.extract_strided_slice %54 {offsets = [0, 96], sizes = [16, 32], strides = [1, 1]} : vector<16x128xf32> to vector<16x32xf32>
    %59 = arith.mulf %56, %38 : vector<16x32xf32>
    %60 = arith.mulf %55, %57 : vector<16x32xf32>
    %61 = arith.addf %59, %60 : vector<16x32xf32>
    %62 = math.tanh %61 : vector<16x32xf32>
    %63 = arith.mulf %58, %62 : vector<16x32xf32>
    %64 = arith.truncf %63 : vector<16x32xf32> to vector<16x32xbf16>
    %65 = arith.index_cast %45 : i32 to index
    %c0_20 = arith.constant 0 : index
    %66 = vector.load %arg12[%65, %c0_20] : memref<128x32xbf16, #tpu.memory_space<vmem>>, vector<16x32xbf16>
    tpu.vector_store %arg12[%65, %c0_20], %64 {strides = array<i32>} : memref<128x32xbf16, #tpu.memory_space<vmem>>, vector<16x32xbf16>,
    %c2_i32 = arith.constant 2 : i32
    %c16_i32_21 = arith.constant 16 : i32
    %67 = arith.muli %c2_i32, %c16_i32_21 : i32
    %68 = tpu.assume_multiple %67, 16 : i32
    %69 = arith.index_cast %68 : i32 to index
    %c0_22 = arith.constant 0 : index
    %70 = vector.load %arg13[%69, %c0_22] : memref<128x128xf32, #tpu.memory_space<vmem>>, vector<16x128xf32>
    %71 = arith.truncf %63 : vector<16x32xf32> to vector<16x32xbf16>
    %cst_23 = arith.constant dense<0.000000e+00> : vector<16x128xf32>
    %72 = tpu.matmul %71, %19, %cst_23 {dimension_numbers = #tpu.dot_dimension_numbers<[1], [0], [0], [1], [0, 0, 1, 1], [], []>} : vector<16x32xbf16>, vector<32x128xbf16>, vector<16x128xf32> -> vector<16x128xf32>
    %73 = arith.addf %70, %72 : vector<16x128xf32>
    %74 = arith.mulf %73, %8 : vector<16x128xf32>
    %75 = math.tanh %74 : vector<16x128xf32>
    %76 = arith.mulf %75, %8 : vector<16x128xf32>
    %77 = arith.addf %76, %11 : vector<16x128xf32>
    %78 = vector.extract_strided_slice %77 {offsets = [0, 0], sizes = [16, 32], strides = [1, 1]} : vector<16x128xf32> to vector<16x32xf32>
    %79 = vector.extract_strided_slice %77 {offsets = [0, 32], sizes = [16, 32], strides = [1, 1]} : vector<16x128xf32> to vector<16x32xf32>
    %80 = vector.extract_strided_slice %77 {offsets = [0, 64], sizes = [16, 32], strides = [1, 1]} : vector<16x128xf32> to vector<16x32xf32>
    %81 = vector.extract_strided_slice %77 {offsets = [0, 96], sizes = [16, 32], strides = [1, 1]} : vector<16x128xf32> to vector<16x32xf32>
    %82 = arith.mulf %79, %61 : vector<16x32xf32>
    %83 = arith.mulf %78, %80 : vector<16x32xf32>
    %84 = arith.addf %82, %83 : vector<16x32xf32>
    %85 = math.tanh %84 : vector<16x32xf32>
    %86 = arith.mulf %81, %85 : vector<16x32xf32>
    %87 = arith.truncf %86 : vector<16x32xf32> to vector<16x32xbf16>
    %88 = arith.index_cast %68 : i32 to index
    %c0_24 = arith.constant 0 : index
    %89 = vector.load %arg12[%88, %c0_24] : memref<128x32xbf16, #tpu.memory_space<vmem>>, vector<16x32xbf16>
    tpu.vector_store %arg12[%88, %c0_24], %87 {strides = array<i32>} : memref<128x32xbf16, #tpu.memory_space<vmem>>, vector<16x32xbf16>,
    %c3_i32 = arith.constant 3 : i32
    %c16_i32_25 = arith.constant 16 : i32
    %90 = arith.muli %c3_i32, %c16_i32_25 : i32
    %91 = tpu.assume_multiple %90, 16 : i32
    %92 = arith.index_cast %91 : i32 to index
    %c0_26 = arith.constant 0 : index
    %93 = vector.load %arg13[%92, %c0_26] : memref<128x128xf32, #tpu.memory_space<vmem>>, vector<16x128xf32>
    %94 = arith.truncf %86 : vector<16x32xf32> to vector<16x32xbf16>
    %cst_27 = arith.constant dense<0.000000e+00> : vector<16x128xf32>
    %95 = tpu.matmul %94, %19, %cst_27 {dimension_numbers = #tpu.dot_dimension_numbers<[1], [0], [0], [1], [0, 0, 1, 1], [], []>} : vector<16x32xbf16>, vector<32x128xbf16>, vector<16x128xf32> -> vector<16x128xf32>
    %96 = arith.addf %93, %95 : vector<16x128xf32>
    %97 = arith.mulf %96, %8 : vector<16x128xf32>
    %98 = math.tanh %97 : vector<16x128xf32>
    %99 = arith.mulf %98, %8 : vector<16x128xf32>
    %100 = arith.addf %99, %11 : vector<16x128xf32>
    %101 = vector.extract_strided_slice %100 {offsets = [0, 0], sizes = [16, 32], strides = [1, 1]} : vector<16x128xf32> to vector<16x32xf32>
    %102 = vector.extract_strided_slice %100 {offsets = [0, 32], sizes = [16, 32], strides = [1, 1]} : vector<16x128xf32> to vector<16x32xf32>
    %103 = vector.extract_strided_slice %100 {offsets = [0, 64], sizes = [16, 32], strides = [1, 1]} : vector<16x128xf32> to vector<16x32xf32>
    %104 = vector.extract_strided_slice %100 {offsets = [0, 96], sizes = [16, 32], strides = [1, 1]} : vector<16x128xf32> to vector<16x32xf32>
    %105 = arith.mulf %102, %84 : vector<16x32xf32>
    %106 = arith.mulf %101, %103 : vector<16x32xf32>
    %107 = arith.addf %105, %106 : vector<16x32xf32>
    %108 = math.tanh %107 : vector<16x32xf32>
    %109 = arith.mulf %104, %108 : vector<16x32xf32>
    %110 = arith.truncf %109 : vector<16x32xf32> to vector<16x32xbf16>
    %111 = arith.index_cast %91 : i32 to index
    %c0_28 = arith.constant 0 : index
    %112 = vector.load %arg12[%111, %c0_28] : memref<128x32xbf16, #tpu.memory_space<vmem>>, vector<16x32xbf16>
    tpu.vector_store %arg12[%111, %c0_28], %110 {strides = array<i32>} : memref<128x32xbf16, #tpu.memory_space<vmem>>, vector<16x32xbf16>,
    %c4_i32 = arith.constant 4 : i32
    %c16_i32_29 = arith.constant 16 : i32
    %113 = arith.muli %c4_i32, %c16_i32_29 : i32
    %114 = tpu.assume_multiple %113, 16 : i32
    %115 = arith.index_cast %114 : i32 to index
    %c0_30 = arith.constant 0 : index
    %116 = vector.load %arg13[%115, %c0_30] : memref<128x128xf32, #tpu.memory_space<vmem>>, vector<16x128xf32>
    %117 = arith.truncf %109 : vector<16x32xf32> to vector<16x32xbf16>
    %cst_31 = arith.constant dense<0.000000e+00> : vector<16x128xf32>
    %118 = tpu.matmul %117, %19, %cst_31 {dimension_numbers = #tpu.dot_dimension_numbers<[1], [0], [0], [1], [0, 0, 1, 1], [], []>} : vector<16x32xbf16>, vector<32x128xbf16>, vector<16x128xf32> -> vector<16x128xf32>
    %119 = arith.addf %116, %118 : vector<16x128xf32>
    %120 = arith.mulf %119, %8 : vector<16x128xf32>
    %121 = math.tanh %120 : vector<16x128xf32>
    %122 = arith.mulf %121, %8 : vector<16x128xf32>
    %123 = arith.addf %122, %11 : vector<16x128xf32>
    %124 = vector.extract_strided_slice %123 {offsets = [0, 0], sizes = [16, 32], strides = [1, 1]} : vector<16x128xf32> to vector<16x32xf32>
    %125 = vector.extract_strided_slice %123 {offsets = [0, 32], sizes = [16, 32], strides = [1, 1]} : vector<16x128xf32> to vector<16x32xf32>
    %126 = vector.extract_strided_slice %123 {offsets = [0, 64], sizes = [16, 32], strides = [1, 1]} : vector<16x128xf32> to vector<16x32xf32>
    %127 = vector.extract_strided_slice %123 {offsets = [0, 96], sizes = [16, 32], strides = [1, 1]} : vector<16x128xf32> to vector<16x32xf32>
    %128 = arith.mulf %125, %107 : vector<16x32xf32>
    %129 = arith.mulf %124, %126 : vector<16x32xf32>
    %130 = arith.addf %128, %129 : vector<16x32xf32>
    %131 = math.tanh %130 : vector<16x32xf32>
    %132 = arith.mulf %127, %131 : vector<16x32xf32>
    %133 = arith.truncf %132 : vector<16x32xf32> to vector<16x32xbf16>
    %134 = arith.index_cast %114 : i32 to index
    %c0_32 = arith.constant 0 : index
    %135 = vector.load %arg12[%134, %c0_32] : memref<128x32xbf16, #tpu.memory_space<vmem>>, vector<16x32xbf16>
    tpu.vector_store %arg12[%134, %c0_32], %133 {strides = array<i32>} : memref<128x32xbf16, #tpu.memory_space<vmem>>, vector<16x32xbf16>,
    %c5_i32 = arith.constant 5 : i32
    %c16_i32_33 = arith.constant 16 : i32
    %136 = arith.muli %c5_i32, %c16_i32_33 : i32
    %137 = tpu.assume_multiple %136, 16 : i32
    %138 = arith.index_cast %137 : i32 to index
    %c0_34 = arith.constant 0 : index
    %139 = vector.load %arg13[%138, %c0_34] : memref<128x128xf32, #tpu.memory_space<vmem>>, vector<16x128xf32>
    %140 = arith.truncf %132 : vector<16x32xf32> to vector<16x32xbf16>
    %cst_35 = arith.constant dense<0.000000e+00> : vector<16x128xf32>
    %141 = tpu.matmul %140, %19, %cst_35 {dimension_numbers = #tpu.dot_dimension_numbers<[1], [0], [0], [1], [0, 0, 1, 1], [], []>} : vector<16x32xbf16>, vector<32x128xbf16>, vector<16x128xf32> -> vector<16x128xf32>
    %142 = arith.addf %139, %141 : vector<16x128xf32>
    %143 = arith.mulf %142, %8 : vector<16x128xf32>
    %144 = math.tanh %143 : vector<16x128xf32>
    %145 = arith.mulf %144, %8 : vector<16x128xf32>
    %146 = arith.addf %145, %11 : vector<16x128xf32>
    %147 = vector.extract_strided_slice %146 {offsets = [0, 0], sizes = [16, 32], strides = [1, 1]} : vector<16x128xf32> to vector<16x32xf32>
    %148 = vector.extract_strided_slice %146 {offsets = [0, 32], sizes = [16, 32], strides = [1, 1]} : vector<16x128xf32> to vector<16x32xf32>
    %149 = vector.extract_strided_slice %146 {offsets = [0, 64], sizes = [16, 32], strides = [1, 1]} : vector<16x128xf32> to vector<16x32xf32>
    %150 = vector.extract_strided_slice %146 {offsets = [0, 96], sizes = [16, 32], strides = [1, 1]} : vector<16x128xf32> to vector<16x32xf32>
    %151 = arith.mulf %148, %130 : vector<16x32xf32>
    %152 = arith.mulf %147, %149 : vector<16x32xf32>
    %153 = arith.addf %151, %152 : vector<16x32xf32>
    %154 = math.tanh %153 : vector<16x32xf32>
    %155 = arith.mulf %150, %154 : vector<16x32xf32>
    %156 = arith.truncf %155 : vector<16x32xf32> to vector<16x32xbf16>
    %157 = arith.index_cast %137 : i32 to index
    %c0_36 = arith.constant 0 : index
    %158 = vector.load %arg12[%157, %c0_36] : memref<128x32xbf16, #tpu.memory_space<vmem>>, vector<16x32xbf16>
    tpu.vector_store %arg12[%157, %c0_36], %156 {strides = array<i32>} : memref<128x32xbf16, #tpu.memory_space<vmem>>, vector<16x32xbf16>,
    %c6_i32 = arith.constant 6 : i32
    %c16_i32_37 = arith.constant 16 : i32
    %159 = arith.muli %c6_i32, %c16_i32_37 : i32
    %160 = tpu.assume_multiple %159, 16 : i32
    %161 = arith.index_cast %160 : i32 to index
    %c0_38 = arith.constant 0 : index
    %162 = vector.load %arg13[%161, %c0_38] : memref<128x128xf32, #tpu.memory_space<vmem>>, vector<16x128xf32>
    %163 = arith.truncf %155 : vector<16x32xf32> to vector<16x32xbf16>
    %cst_39 = arith.constant dense<0.000000e+00> : vector<16x128xf32>
    %164 = tpu.matmul %163, %19, %cst_39 {dimension_numbers = #tpu.dot_dimension_numbers<[1], [0], [0], [1], [0, 0, 1, 1], [], []>} : vector<16x32xbf16>, vector<32x128xbf16>, vector<16x128xf32> -> vector<16x128xf32>
    %165 = arith.addf %162, %164 : vector<16x128xf32>
    %166 = arith.mulf %165, %8 : vector<16x128xf32>
    %167 = math.tanh %166 : vector<16x128xf32>
    %168 = arith.mulf %167, %8 : vector<16x128xf32>
    %169 = arith.addf %168, %11 : vector<16x128xf32>
    %170 = vector.extract_strided_slice %169 {offsets = [0, 0], sizes = [16, 32], strides = [1, 1]} : vector<16x128xf32> to vector<16x32xf32>
    %171 = vector.extract_strided_slice %169 {offsets = [0, 32], sizes = [16, 32], strides = [1, 1]} : vector<16x128xf32> to vector<16x32xf32>
    %172 = vector.extract_strided_slice %169 {offsets = [0, 64], sizes = [16, 32], strides = [1, 1]} : vector<16x128xf32> to vector<16x32xf32>
    %173 = vector.extract_strided_slice %169 {offsets = [0, 96], sizes = [16, 32], strides = [1, 1]} : vector<16x128xf32> to vector<16x32xf32>
    %174 = arith.mulf %171, %153 : vector<16x32xf32>
    %175 = arith.mulf %170, %172 : vector<16x32xf32>
    %176 = arith.addf %174, %175 : vector<16x32xf32>
    %177 = math.tanh %176 : vector<16x32xf32>
    %178 = arith.mulf %173, %177 : vector<16x32xf32>
    %179 = arith.truncf %178 : vector<16x32xf32> to vector<16x32xbf16>
    %180 = arith.index_cast %160 : i32 to index
    %c0_40 = arith.constant 0 : index
    %181 = vector.load %arg12[%180, %c0_40] : memref<128x32xbf16, #tpu.memory_space<vmem>>, vector<16x32xbf16>
    tpu.vector_store %arg12[%180, %c0_40], %179 {strides = array<i32>} : memref<128x32xbf16, #tpu.memory_space<vmem>>, vector<16x32xbf16>,
    %c7_i32 = arith.constant 7 : i32
    %c16_i32_41 = arith.constant 16 : i32
    %182 = arith.muli %c7_i32, %c16_i32_41 : i32
    %183 = tpu.assume_multiple %182, 16 : i32
    %184 = arith.index_cast %183 : i32 to index
    %c0_42 = arith.constant 0 : index
    %185 = vector.load %arg13[%184, %c0_42] : memref<128x128xf32, #tpu.memory_space<vmem>>, vector<16x128xf32>
    %186 = arith.truncf %178 : vector<16x32xf32> to vector<16x32xbf16>
    %cst_43 = arith.constant dense<0.000000e+00> : vector<16x128xf32>
    %187 = tpu.matmul %186, %19, %cst_43 {dimension_numbers = #tpu.dot_dimension_numbers<[1], [0], [0], [1], [0, 0, 1, 1], [], []>} : vector<16x32xbf16>, vector<32x128xbf16>, vector<16x128xf32> -> vector<16x128xf32>
    %188 = arith.addf %185, %187 : vector<16x128xf32>
    %189 = arith.mulf %188, %8 : vector<16x128xf32>
    %190 = math.tanh %189 : vector<16x128xf32>
    %191 = arith.mulf %190, %8 : vector<16x128xf32>
    %192 = arith.addf %191, %11 : vector<16x128xf32>
    %193 = vector.extract_strided_slice %192 {offsets = [0, 0], sizes = [16, 32], strides = [1, 1]} : vector<16x128xf32> to vector<16x32xf32>
    %194 = vector.extract_strided_slice %192 {offsets = [0, 32], sizes = [16, 32], strides = [1, 1]} : vector<16x128xf32> to vector<16x32xf32>
    %195 = vector.extract_strided_slice %192 {offsets = [0, 64], sizes = [16, 32], strides = [1, 1]} : vector<16x128xf32> to vector<16x32xf32>
    %196 = vector.extract_strided_slice %192 {offsets = [0, 96], sizes = [16, 32], strides = [1, 1]} : vector<16x128xf32> to vector<16x32xf32>
    %197 = arith.mulf %194, %176 : vector<16x32xf32>
    %198 = arith.mulf %193, %195 : vector<16x32xf32>
    %199 = arith.addf %197, %198 : vector<16x32xf32>
    %200 = math.tanh %199 : vector<16x32xf32>
    %201 = arith.mulf %196, %200 : vector<16x32xf32>
    %202 = arith.truncf %201 : vector<16x32xf32> to vector<16x32xbf16>
    %203 = arith.index_cast %183 : i32 to index
    %c0_44 = arith.constant 0 : index
    %204 = vector.load %arg12[%203, %c0_44] : memref<128x32xbf16, #tpu.memory_space<vmem>>, vector<16x32xbf16>
    tpu.vector_store %arg12[%203, %c0_44], %202 {strides = array<i32>} : memref<128x32xbf16, #tpu.memory_space<vmem>>, vector<16x32xbf16>,
    %c8_i32 = arith.constant 8 : i32
    %c0_45 = arith.constant 0 : index
    %c0_46 = arith.constant 0 : index
    %205 = vector.load %arg12[%c0_45, %c0_46] : memref<128x32xbf16, #tpu.memory_space<vmem>>, vector<128x32xbf16>
    %c0_47 = arith.constant 0 : index
    %c0_48 = arith.constant 0 : index
    %206 = vector.load %arg4[%c0_47, %c0_48] : memref<32x128xbf16, #tpu.memory_space<vmem>>, vector<32x128xbf16>
    %cst_49 = arith.constant dense<0.000000e+00> : vector<128x128xf32>
    %207 = tpu.matmul %205, %206, %cst_49 {dimension_numbers = #tpu.dot_dimension_numbers<[1], [0], [0], [1], [0, 0, 1, 1], [], []>} : vector<128x32xbf16>, vector<32x128xbf16>, vector<128x128xf32> -> vector<128x128xf32>
    %c0_50 = arith.constant 0 : index
    %c0_51 = arith.constant 0 : index
    %208 = vector.load %arg6[%c0_50, %c0_51] : memref<1x128xf32, #tpu.memory_space<vmem>>, vector<1x128xf32>
    %209 = vector.broadcast %208 : vector<1x128xf32> to vector<128x128xf32>
    %210 = arith.addf %207, %209 : vector<128x128xf32>
    %c0_52 = arith.constant 0 : index
    %c0_53 = arith.constant 0 : index
    %211 = vector.load %arg13[%c0_52, %c0_53] : memref<128x128xf32, #tpu.memory_space<vmem>>, vector<128x128xf32>
    tpu.vector_store %arg13[%c0_52, %c0_53], %210 {strides = array<i32>} : memref<128x128xf32, #tpu.memory_space<vmem>>, vector<128x128xf32>,
    %c0_54 = arith.constant 0 : index
    %c0_55 = arith.constant 0 : index
    %212 = vector.load %arg5[%c0_54, %c0_55] : memref<32x128xbf16, #tpu.memory_space<vmem>>, vector<32x128xbf16>
    %cst_56 = arith.constant 0.000000e+00 : f32
    %213 = vector.broadcast %cst_56 : f32 to vector<16x32xf32>
    %c0_i32_57 = arith.constant 0 : i32
    %c16_i32_58 = arith.constant 16 : i32
    %214 = arith.muli %c0_i32_57, %c16_i32_58 : i32
    %215 = tpu.assume_multiple %214, 16 : i32
    %216 = arith.index_cast %215 : i32 to index
    %c0_59 = arith.constant 0 : index
    %217 = vector.load %arg13[%216, %c0_59] : memref<128x128xf32, #tpu.memory_space<vmem>>, vector<16x128xf32>
    %218 = arith.truncf %213 : vector<16x32xf32> to vector<16x32xbf16>
    %cst_60 = arith.constant dense<0.000000e+00> : vector<16x128xf32>
    %219 = tpu.matmul %218, %212, %cst_60 {dimension_numbers = #tpu.dot_dimension_numbers<[1], [0], [0], [1], [0, 0, 1, 1], [], []>} : vector<16x32xbf16>, vector<32x128xbf16>, vector<16x128xf32> -> vector<16x128xf32>
    %220 = arith.addf %217, %219 : vector<16x128xf32>
    %221 = arith.mulf %220, %8 : vector<16x128xf32>
    %222 = math.tanh %221 : vector<16x128xf32>
    %223 = arith.mulf %222, %8 : vector<16x128xf32>
    %224 = arith.addf %223, %11 : vector<16x128xf32>
    %225 = vector.extract_strided_slice %224 {offsets = [0, 0], sizes = [16, 32], strides = [1, 1]} : vector<16x128xf32> to vector<16x32xf32>
    %226 = vector.extract_strided_slice %224 {offsets = [0, 32], sizes = [16, 32], strides = [1, 1]} : vector<16x128xf32> to vector<16x32xf32>
    %227 = vector.extract_strided_slice %224 {offsets = [0, 64], sizes = [16, 32], strides = [1, 1]} : vector<16x128xf32> to vector<16x32xf32>
    %228 = vector.extract_strided_slice %224 {offsets = [0, 96], sizes = [16, 32], strides = [1, 1]} : vector<16x128xf32> to vector<16x32xf32>
    %229 = arith.mulf %226, %213 : vector<16x32xf32>
    %230 = arith.mulf %225, %227 : vector<16x32xf32>
    %231 = arith.addf %229, %230 : vector<16x32xf32>
    %232 = math.tanh %231 : vector<16x32xf32>
    %233 = arith.mulf %228, %232 : vector<16x32xf32>
    %c1_i32_61 = arith.constant 1 : i32
    %c16_i32_62 = arith.constant 16 : i32
    %234 = arith.muli %c1_i32_61, %c16_i32_62 : i32
    %235 = tpu.assume_multiple %234, 16 : i32
    %236 = arith.index_cast %235 : i32 to index
    %c0_63 = arith.constant 0 : index
    %237 = vector.load %arg13[%236, %c0_63] : memref<128x128xf32, #tpu.memory_space<vmem>>, vector<16x128xf32>
    %238 = arith.truncf %233 : vector<16x32xf32> to vector<16x32xbf16>
    %cst_64 = arith.constant dense<0.000000e+00> : vector<16x128xf32>
    %239 = tpu.matmul %238, %212, %cst_64 {dimension_numbers = #tpu.dot_dimension_numbers<[1], [0], [0], [1], [0, 0, 1, 1], [], []>} : vector<16x32xbf16>, vector<32x128xbf16>, vector<16x128xf32> -> vector<16x128xf32>
    %240 = arith.addf %237, %239 : vector<16x128xf32>
    %241 = arith.mulf %240, %8 : vector<16x128xf32>
    %242 = math.tanh %241 : vector<16x128xf32>
    %243 = arith.mulf %242, %8 : vector<16x128xf32>
    %244 = arith.addf %243, %11 : vector<16x128xf32>
    %245 = vector.extract_strided_slice %244 {offsets = [0, 0], sizes = [16, 32], strides = [1, 1]} : vector<16x128xf32> to vector<16x32xf32>
    %246 = vector.extract_strided_slice %244 {offsets = [0, 32], sizes = [16, 32], strides = [1, 1]} : vector<16x128xf32> to vector<16x32xf32>
    %247 = vector.extract_strided_slice %244 {offsets = [0, 64], sizes = [16, 32], strides = [1, 1]} : vector<16x128xf32> to vector<16x32xf32>
    %248 = vector.extract_strided_slice %244 {offsets = [0, 96], sizes = [16, 32], strides = [1, 1]} : vector<16x128xf32> to vector<16x32xf32>
    %249 = arith.mulf %246, %231 : vector<16x32xf32>
    %250 = arith.mulf %245, %247 : vector<16x32xf32>
    %251 = arith.addf %249, %250 : vector<16x32xf32>
    %252 = math.tanh %251 : vector<16x32xf32>
    %253 = arith.mulf %248, %252 : vector<16x32xf32>
    %c2_i32_65 = arith.constant 2 : i32
    %c16_i32_66 = arith.constant 16 : i32
    %254 = arith.muli %c2_i32_65, %c16_i32_66 : i32
    %255 = tpu.assume_multiple %254, 16 : i32
    %256 = arith.index_cast %255 : i32 to index
    %c0_67 = arith.constant 0 : index
    %257 = vector.load %arg13[%256, %c0_67] : memref<128x128xf32, #tpu.memory_space<vmem>>, vector<16x128xf32>
    %258 = arith.truncf %253 : vector<16x32xf32> to vector<16x32xbf16>
    %cst_68 = arith.constant dense<0.000000e+00> : vector<16x128xf32>
    %259 = tpu.matmul %258, %212, %cst_68 {dimension_numbers = #tpu.dot_dimension_numbers<[1], [0], [0], [1], [0, 0, 1, 1], [], []>} : vector<16x32xbf16>, vector<32x128xbf16>, vector<16x128xf32> -> vector<16x128xf32>
    %260 = arith.addf %257, %259 : vector<16x128xf32>
    %261 = arith.mulf %260, %8 : vector<16x128xf32>
    %262 = math.tanh %261 : vector<16x128xf32>
    %263 = arith.mulf %262, %8 : vector<16x128xf32>
    %264 = arith.addf %263, %11 : vector<16x128xf32>
    %265 = vector.extract_strided_slice %264 {offsets = [0, 0], sizes = [16, 32], strides = [1, 1]} : vector<16x128xf32> to vector<16x32xf32>
    %266 = vector.extract_strided_slice %264 {offsets = [0, 32], sizes = [16, 32], strides = [1, 1]} : vector<16x128xf32> to vector<16x32xf32>
    %267 = vector.extract_strided_slice %264 {offsets = [0, 64], sizes = [16, 32], strides = [1, 1]} : vector<16x128xf32> to vector<16x32xf32>
    %268 = vector.extract_strided_slice %264 {offsets = [0, 96], sizes = [16, 32], strides = [1, 1]} : vector<16x128xf32> to vector<16x32xf32>
    %269 = arith.mulf %266, %251 : vector<16x32xf32>
    %270 = arith.mulf %265, %267 : vector<16x32xf32>
    %271 = arith.addf %269, %270 : vector<16x32xf32>
    %272 = math.tanh %271 : vector<16x32xf32>
    %273 = arith.mulf %268, %272 : vector<16x32xf32>
    %c3_i32_69 = arith.constant 3 : i32
    %c16_i32_70 = arith.constant 16 : i32
    %274 = arith.muli %c3_i32_69, %c16_i32_70 : i32
    %275 = tpu.assume_multiple %274, 16 : i32
    %276 = arith.index_cast %275 : i32 to index
    %c0_71 = arith.constant 0 : index
    %277 = vector.load %arg13[%276, %c0_71] : memref<128x128xf32, #tpu.memory_space<vmem>>, vector<16x128xf32>
    %278 = arith.truncf %273 : vector<16x32xf32> to vector<16x32xbf16>
    %cst_72 = arith.constant dense<0.000000e+00> : vector<16x128xf32>
    %279 = tpu.matmul %278, %212, %cst_72 {dimension_numbers = #tpu.dot_dimension_numbers<[1], [0], [0], [1], [0, 0, 1, 1], [], []>} : vector<16x32xbf16>, vector<32x128xbf16>, vector<16x128xf32> -> vector<16x128xf32>
    %280 = arith.addf %277, %279 : vector<16x128xf32>
    %281 = arith.mulf %280, %8 : vector<16x128xf32>
    %282 = math.tanh %281 : vector<16x128xf32>
    %283 = arith.mulf %282, %8 : vector<16x128xf32>
    %284 = arith.addf %283, %11 : vector<16x128xf32>
    %285 = vector.extract_strided_slice %284 {offsets = [0, 0], sizes = [16, 32], strides = [1, 1]} : vector<16x128xf32> to vector<16x32xf32>
    %286 = vector.extract_strided_slice %284 {offsets = [0, 32], sizes = [16, 32], strides = [1, 1]} : vector<16x128xf32> to vector<16x32xf32>
    %287 = vector.extract_strided_slice %284 {offsets = [0, 64], sizes = [16, 32], strides = [1, 1]} : vector<16x128xf32> to vector<16x32xf32>
    %288 = vector.extract_strided_slice %284 {offsets = [0, 96], sizes = [16, 32], strides = [1, 1]} : vector<16x128xf32> to vector<16x32xf32>
    %289 = arith.mulf %286, %271 : vector<16x32xf32>
    %290 = arith.mulf %285, %287 : vector<16x32xf32>
    %291 = arith.addf %289, %290 : vector<16x32xf32>
    %292 = math.tanh %291 : vector<16x32xf32>
    %293 = arith.mulf %288, %292 : vector<16x32xf32>
    %c4_i32_73 = arith.constant 4 : i32
    %c16_i32_74 = arith.constant 16 : i32
    %294 = arith.muli %c4_i32_73, %c16_i32_74 : i32
    %295 = tpu.assume_multiple %294, 16 : i32
    %296 = arith.index_cast %295 : i32 to index
    %c0_75 = arith.constant 0 : index
    %297 = vector.load %arg13[%296, %c0_75] : memref<128x128xf32, #tpu.memory_space<vmem>>, vector<16x128xf32>
    %298 = arith.truncf %293 : vector<16x32xf32> to vector<16x32xbf16>
    %cst_76 = arith.constant dense<0.000000e+00> : vector<16x128xf32>
    %299 = tpu.matmul %298, %212, %cst_76 {dimension_numbers = #tpu.dot_dimension_numbers<[1], [0], [0], [1], [0, 0, 1, 1], [], []>} : vector<16x32xbf16>, vector<32x128xbf16>, vector<16x128xf32> -> vector<16x128xf32>
    %300 = arith.addf %297, %299 : vector<16x128xf32>
    %301 = arith.mulf %300, %8 : vector<16x128xf32>
    %302 = math.tanh %301 : vector<16x128xf32>
    %303 = arith.mulf %302, %8 : vector<16x128xf32>
    %304 = arith.addf %303, %11 : vector<16x128xf32>
    %305 = vector.extract_strided_slice %304 {offsets = [0, 0], sizes = [16, 32], strides = [1, 1]} : vector<16x128xf32> to vector<16x32xf32>
    %306 = vector.extract_strided_slice %304 {offsets = [0, 32], sizes = [16, 32], strides = [1, 1]} : vector<16x128xf32> to vector<16x32xf32>
    %307 = vector.extract_strided_slice %304 {offsets = [0, 64], sizes = [16, 32], strides = [1, 1]} : vector<16x128xf32> to vector<16x32xf32>
    %308 = vector.extract_strided_slice %304 {offsets = [0, 96], sizes = [16, 32], strides = [1, 1]} : vector<16x128xf32> to vector<16x32xf32>
    %309 = arith.mulf %306, %291 : vector<16x32xf32>
    %310 = arith.mulf %305, %307 : vector<16x32xf32>
    %311 = arith.addf %309, %310 : vector<16x32xf32>
    %312 = math.tanh %311 : vector<16x32xf32>
    %313 = arith.mulf %308, %312 : vector<16x32xf32>
    %c5_i32_77 = arith.constant 5 : i32
    %c16_i32_78 = arith.constant 16 : i32
    %314 = arith.muli %c5_i32_77, %c16_i32_78 : i32
    %315 = tpu.assume_multiple %314, 16 : i32
    %316 = arith.index_cast %315 : i32 to index
    %c0_79 = arith.constant 0 : index
    %317 = vector.load %arg13[%316, %c0_79] : memref<128x128xf32, #tpu.memory_space<vmem>>, vector<16x128xf32>
    %318 = arith.truncf %313 : vector<16x32xf32> to vector<16x32xbf16>
    %cst_80 = arith.constant dense<0.000000e+00> : vector<16x128xf32>
    %319 = tpu.matmul %318, %212, %cst_80 {dimension_numbers = #tpu.dot_dimension_numbers<[1], [0], [0], [1], [0, 0, 1, 1], [], []>} : vector<16x32xbf16>, vector<32x128xbf16>, vector<16x128xf32> -> vector<16x128xf32>
    %320 = arith.addf %317, %319 : vector<16x128xf32>
    %321 = arith.mulf %320, %8 : vector<16x128xf32>
    %322 = math.tanh %321 : vector<16x128xf32>
    %323 = arith.mulf %322, %8 : vector<16x128xf32>
    %324 = arith.addf %323, %11 : vector<16x128xf32>
    %325 = vector.extract_strided_slice %324 {offsets = [0, 0], sizes = [16, 32], strides = [1, 1]} : vector<16x128xf32> to vector<16x32xf32>
    %326 = vector.extract_strided_slice %324 {offsets = [0, 32], sizes = [16, 32], strides = [1, 1]} : vector<16x128xf32> to vector<16x32xf32>
    %327 = vector.extract_strided_slice %324 {offsets = [0, 64], sizes = [16, 32], strides = [1, 1]} : vector<16x128xf32> to vector<16x32xf32>
    %328 = vector.extract_strided_slice %324 {offsets = [0, 96], sizes = [16, 32], strides = [1, 1]} : vector<16x128xf32> to vector<16x32xf32>
    %329 = arith.mulf %326, %311 : vector<16x32xf32>
    %330 = arith.mulf %325, %327 : vector<16x32xf32>
    %331 = arith.addf %329, %330 : vector<16x32xf32>
    %332 = math.tanh %331 : vector<16x32xf32>
    %333 = arith.mulf %328, %332 : vector<16x32xf32>
    %c6_i32_81 = arith.constant 6 : i32
    %c16_i32_82 = arith.constant 16 : i32
    %334 = arith.muli %c6_i32_81, %c16_i32_82 : i32
    %335 = tpu.assume_multiple %334, 16 : i32
    %336 = arith.index_cast %335 : i32 to index
    %c0_83 = arith.constant 0 : index
    %337 = vector.load %arg13[%336, %c0_83] : memref<128x128xf32, #tpu.memory_space<vmem>>, vector<16x128xf32>
    %338 = arith.truncf %333 : vector<16x32xf32> to vector<16x32xbf16>
    %cst_84 = arith.constant dense<0.000000e+00> : vector<16x128xf32>
    %339 = tpu.matmul %338, %212, %cst_84 {dimension_numbers = #tpu.dot_dimension_numbers<[1], [0], [0], [1], [0, 0, 1, 1], [], []>} : vector<16x32xbf16>, vector<32x128xbf16>, vector<16x128xf32> -> vector<16x128xf32>
    %340 = arith.addf %337, %339 : vector<16x128xf32>
    %341 = arith.mulf %340, %8 : vector<16x128xf32>
    %342 = math.tanh %341 : vector<16x128xf32>
    %343 = arith.mulf %342, %8 : vector<16x128xf32>
    %344 = arith.addf %343, %11 : vector<16x128xf32>
    %345 = vector.extract_strided_slice %344 {offsets = [0, 0], sizes = [16, 32], strides = [1, 1]} : vector<16x128xf32> to vector<16x32xf32>
    %346 = vector.extract_strided_slice %344 {offsets = [0, 32], sizes = [16, 32], strides = [1, 1]} : vector<16x128xf32> to vector<16x32xf32>
    %347 = vector.extract_strided_slice %344 {offsets = [0, 64], sizes = [16, 32], strides = [1, 1]} : vector<16x128xf32> to vector<16x32xf32>
    %348 = vector.extract_strided_slice %344 {offsets = [0, 96], sizes = [16, 32], strides = [1, 1]} : vector<16x128xf32> to vector<16x32xf32>
    %349 = arith.mulf %346, %331 : vector<16x32xf32>
    %350 = arith.mulf %345, %347 : vector<16x32xf32>
    %351 = arith.addf %349, %350 : vector<16x32xf32>
    %352 = math.tanh %351 : vector<16x32xf32>
    %353 = arith.mulf %348, %352 : vector<16x32xf32>
    %c7_i32_85 = arith.constant 7 : i32
    %c16_i32_86 = arith.constant 16 : i32
    %354 = arith.muli %c7_i32_85, %c16_i32_86 : i32
    %355 = tpu.assume_multiple %354, 16 : i32
    %356 = arith.index_cast %355 : i32 to index
    %c0_87 = arith.constant 0 : index
    %357 = vector.load %arg13[%356, %c0_87] : memref<128x128xf32, #tpu.memory_space<vmem>>, vector<16x128xf32>
    %358 = arith.truncf %353 : vector<16x32xf32> to vector<16x32xbf16>
    %cst_88 = arith.constant dense<0.000000e+00> : vector<16x128xf32>
    %359 = tpu.matmul %358, %212, %cst_88 {dimension_numbers = #tpu.dot_dimension_numbers<[1], [0], [0], [1], [0, 0, 1, 1], [], []>} : vector<16x32xbf16>, vector<32x128xbf16>, vector<16x128xf32> -> vector<16x128xf32>
    %360 = arith.addf %357, %359 : vector<16x128xf32>
    %361 = arith.mulf %360, %8 : vector<16x128xf32>
    %362 = math.tanh %361 : vector<16x128xf32>
    %363 = arith.mulf %362, %8 : vector<16x128xf32>
    %364 = arith.addf %363, %11 : vector<16x128xf32>
    %365 = vector.extract_strided_slice %364 {offsets = [0, 0], sizes = [16, 32], strides = [1, 1]} : vector<16x128xf32> to vector<16x32xf32>
    %366 = vector.extract_strided_slice %364 {offsets = [0, 32], sizes = [16, 32], strides = [1, 1]} : vector<16x128xf32> to vector<16x32xf32>
    %367 = vector.extract_strided_slice %364 {offsets = [0, 64], sizes = [16, 32], strides = [1, 1]} : vector<16x128xf32> to vector<16x32xf32>
    %368 = vector.extract_strided_slice %364 {offsets = [0, 96], sizes = [16, 32], strides = [1, 1]} : vector<16x128xf32> to vector<16x32xf32>
    %369 = arith.mulf %366, %351 : vector<16x32xf32>
    %370 = arith.mulf %365, %367 : vector<16x32xf32>
    %371 = arith.addf %369, %370 : vector<16x32xf32>
    %372 = math.tanh %371 : vector<16x32xf32>
    %373 = arith.mulf %368, %372 : vector<16x32xf32>
    %c8_i32_89 = arith.constant 8 : i32
    %374 = arith.truncf %373 : vector<16x32xf32> to vector<16x32xbf16>
    %c0_90 = arith.constant 0 : index
    %c0_91 = arith.constant 0 : index
    %375 = vector.load %arg7[%c0_90, %c0_91] : memref<32x128xbf16, #tpu.memory_space<vmem>>, vector<32x128xbf16>
    %cst_92 = arith.constant dense<0.000000e+00> : vector<16x128xf32>
    %376 = tpu.matmul %374, %375, %cst_92 {dimension_numbers = #tpu.dot_dimension_numbers<[1], [0], [0], [1], [0, 0, 1, 1], [], []>} : vector<16x32xbf16>, vector<32x128xbf16>, vector<16x128xf32> -> vector<16x128xf32>
    %c0_93 = arith.constant 0 : index
    %c0_94 = arith.constant 0 : index
    %377 = vector.load %arg8[%c0_93, %c0_94] : memref<1x128xf32, #tpu.memory_space<vmem>>, vector<1x128xf32>
    %378 = vector.broadcast %377 : vector<1x128xf32> to vector<16x128xf32>
    %379 = arith.addf %376, %378 : vector<16x128xf32>
    %cst_95 = arith.constant 0.000000e+00 : f32
    %380 = vector.broadcast %cst_95 : f32 to vector<16x128xf32>
    %381 = arith.maximumf %379, %380 : vector<16x128xf32>
    %382 = arith.truncf %381 : vector<16x128xf32> to vector<16x128xbf16>
    %c0_96 = arith.constant 0 : index
    %c0_97 = arith.constant 0 : index
    %383 = vector.load %arg9[%c0_96, %c0_97] : memref<128x128xbf16, #tpu.memory_space<vmem>>, vector<128x128xbf16>
    %cst_98 = arith.constant dense<0.000000e+00> : vector<16x128xf32>
    %384 = tpu.matmul %382, %383, %cst_98 {dimension_numbers = #tpu.dot_dimension_numbers<[1], [0], [0], [1], [0, 0, 1, 1], [], []>} : vector<16x128xbf16>, vector<128x128xbf16>, vector<16x128xf32> -> vector<16x128xf32>
    %c0_99 = arith.constant 0 : index
    %c0_100 = arith.constant 0 : index
    %385 = vector.load %arg10[%c0_99, %c0_100] : memref<1x128xf32, #tpu.memory_space<vmem>>, vector<1x128xf32>
    %386 = vector.broadcast %385 : vector<1x128xf32> to vector<16x128xf32>
    %387 = arith.addf %384, %386 : vector<16x128xf32>
    %c0_101 = arith.constant 0 : index
    %c0_102 = arith.constant 0 : index
    %388 = vector.load %arg11[%c0_101, %c0_102] : memref<16x128xf32, #tpu.memory_space<vmem>>, vector<16x128xf32>
    tpu.vector_store %arg11[%c0_101, %c0_102], %387 {strides = array<i32>} : memref<16x128xf32, #tpu.memory_space<vmem>>, vector<16x128xf32>,
    return
  }
}

</mosaic_0001>

<bundles_post_ra>
// kernel: lstm_model_forward.1
= control target key start
LH: loop header
LB: loop body
LE: loop exit
PB: predicated region body
PF: predicated region fallthrough
CT: control target
= control target key end

     0   :  { %16 = vsyncpa [#allocation5], 0  ;;  %s3516_s0 = inlined_call_operand.vmem [shape: bf16[128,16], index: 0, kind: input, shape index: {}]   ;;  %s3517_s1 = inlined_call_operand.hbm [shape: bf16[16,128], index: 1, kind: input, shape index: {}]   ;;  %s3518_s2 = inlined_call_operand.vmem [shape: bf16[32,128], index: 2, kind: input, shape index: {}]   ;;  %s3519_s3 = inlined_call_operand.vmem [shape: f32[1,128], index: 3, kind: input, shape index: {}]   ;;  %s3520_s4 = inlined_call_operand.vmem [shape: bf16[32,128], index: 4, kind: input, shape index: {}]   ;;  %s3521_s5 = inlined_call_operand.vmem [shape: bf16[32,128], index: 5, kind: input, shape index: {}]   ;;  %s3522_s6 = inlined_call_operand.vmem [shape: f32[1,128], index: 6, kind: input, shape index: {}]   ;;  %s3523_s7 = inlined_call_operand.vmem [shape: bf16[32,128], index: 7, kind: input, shape index: {}]   ;;  %s3524_s8 = inlined_call_operand.hbm [shape: f32[1,128], index: 8, kind: input, shape index: {}]   ;;  %s3525_s9 = inlined_call_operand.vmem [shape: bf16[128,128], index: 9, kind: input, shape index: {}]   ;;  %s3526_s10 = inlined_call_operand.hbm [shape: f32[1,128], index: 10, kind: input, shape index: {}]   ;;  %s3527_s11 = inlined_call_operand.vmem [shape: f32[16,128], index: 11, kind: output, shape index: {}]  }
   0x1   :  { %17 = vsyncpa [#allocation7], 0  ;;  %s2780_s17 = smov [#allocation6]   ;;  %s2781_s19 = smov [#allocation4]  }
   0x2   :  { %s50_s18 = sshll.u32 %s2780_s17, 4  ;;  %s25_s20 = sshll.u32 %s2781_s19, 4  ;;  %s51_s18 = int_to_ptr.vmem [resolvable:$true] %s50_s18  ;;  %s2850_s20 = int_to_ptr.vmem [resolvable:$true] %s25_s20 }
   0x3   :  { %s2710_s23 = scalar_lea.hbm %s3524_s8, 16 }
   0x4   :  { %p2711_p0 = scmp.ne.s32.totalorder %s3524_s8, %s2710_s23  ;;  %p2714_p1 = scmp.lt.u32.totalorder %s2710_s23, %s3524_s8 }
   0x6   :  { %p2716_p2 = pnand %p2714_p1, %p2711_p0 }
   0x8   :  { %2719 = shalt.err (!%p2716_p2)
}
   0x9   :  { %s2720_s28 = scalar_lea.vmem %s51_s18, 16  ;;  %s2724_s29 = scalar_lea.vmem %s51_s18, 32 }
   0xa   :  { %p2721_p3 = scmp.ne.s32.totalorder %s51_s18, %s2720_s28  ;;  %p2725_p4 = scmp.lt.s32.totalorder %s51_s18, %s51_s18 }
   0xb   :  { %p2726_p5 = scmp.lt.s32.totalorder %s2724_s29, %s2720_s28 }
   0xd   :  { %p2727_p6 = por %p2726_p5, %p2725_p4 }
   0xf   :  { %p2728_p7 = pnand %p2727_p6, %p2721_p3 }
  0x11   :  { %2731 = shalt.err (!%p2728_p7)
}
  0x12   :  { %53 = dma.hbm_to_vmem [thread:$0]  %s3524_s8, 16, %s51_s18, [#allocation7]  }
  0x13   :  { %s2732_s15 = scalar_lea.hbm %s3517_s1, 128 }
  0x14   :  { %p2733_p8 = scmp.ne.s32.totalorder %s3517_s1, %s2732_s15  ;;  %p2736_p9 = scmp.lt.u32.totalorder %s2732_s15, %s3517_s1 }
  0x16   :  { %p2738_p10 = pnand %p2736_p9, %p2733_p8 }
  0x18   :  { %2741 = shalt.err (!%p2738_p10)
}
  0x19   :  { %s2742_s22 = scalar_lea.vmem %s2850_s20, 128  ;;  %p2747_p12 = scmp.lt.s32.totalorder %s2850_s20, %s2850_s20 }
  0x1a   :  { %p2743_p11 = scmp.ne.s32.totalorder %s2850_s20, %s2742_s22  ;;  %p2748_p13 = scmp.lt.s32.totalorder %s2742_s22, %s2742_s22 }
  0x1c   :  { %p2749_p0 = por %p2748_p13, %p2747_p12 }
  0x1e   :  { %p2750_p1 = pnand %p2749_p0, %p2743_p11 }
  0x20   :  { %2753 = shalt.err (!%p2750_p1)
}
  0x21   :  { %s2782_s8 = smov 64   ;;  %s2783_s18 = smov 4  }
  0x22   :  { %31 = dma.hbm_to_vmem [thread:$0]  %s3517_s1, 128, %s2850_s20, [#allocation5], %s2782_s8, %s2782_s8, %s2783_s18  }
  0x23   :  { %s2784_s25 = smov [#allocation8]   ;;  %s2754_s29 = scalar_lea.hbm %s3526_s10, 16 }
  0x24   :  { %s62_s26 = sshll.u32 %s2784_s25, 4  ;;  %p2755_p2 = scmp.ne.s32.totalorder %s3526_s10, %s2754_s29  ;;  %s63_s26 = int_to_ptr.vmem [resolvable:$true] %s62_s26 }
  0x25   :  { %p2758_p3 = scmp.lt.u32.totalorder %s2754_s29, %s3526_s10 }
  0x27   :  { %p2760_p4 = pnand %p2758_p3, %p2755_p2 }
  0x29   :  { %2763 = shalt.err (!%p2760_p4)
}
  0x2a   :  { %s2764_s15 = scalar_lea.vmem %s63_s26, 16  ;;  %s2768_s1 = scalar_lea.vmem %s63_s26, 32 }
  0x2b   :  { %p2765_p5 = scmp.ne.s32.totalorder %s63_s26, %s2764_s15  ;;  %p2769_p6 = scmp.lt.s32.totalorder %s63_s26, %s63_s26 }
  0x2c   :  { %p2770_p7 = scmp.lt.s32.totalorder %s2768_s1, %s2764_s15 }
  0x2e   :  { %p2771_p8 = por %p2770_p7, %p2769_p6 }
  0x30   :  { %p2772_p9 = pnand %p2771_p8, %p2765_p5 }
  0x32   :  { %2775 = shalt.err (!%p2772_p9)
}
  0x33   :  { %65 = dma.hbm_to_vmem [thread:$0]  %s3526_s10, 16, %s63_s26, [#allocation7]  }
  0x34   :  { %2776 = dma.done.wait [#allocation5], 128  }
  0x35   :  { %2777 = vsyncadd [#allocation5], 4294967168 }
  0x36   :  { %2778 = dma.done.wait [#allocation7], 32  }
  0x37   :  { %2779 = vsyncadd [#allocation7], 4294967264  ;;  %v2785_v0 = vmov 0.0   ;;  %vm2786_vm0 = vmmov 0   ;;  %v2557_v1 = vld [vmem:[#allocation4] sm:$0xff]   ;;  %vm154_vm1 = vcmask 130048   ;;  %v76_v33 = vlaneseq }
  0x38   :  { %2387 = vmatprep.subr.bf16.mxu1 %v2785_v0  ;;  %2391 = vmatprep.mubr.msk.bf16.mxu1 %vm2786_vm0, %v2785_v0  ;;  %v2558_v2 = vld [vmem:[%s3516_s0] sm:$0xff]   ;;  %v2559_v3 = vld [vmem:[%s3516_s0 + $0x8] sm:$0xff]   ;;  %v2561_v5 = vld [vmem:[%s3516_s0 + $0x10] sm:$0xff]   ;;  %v2787_v12 = vmov 0   ;;  %v2788_v48 = vmov 0.5   ;;  %vm310_vm5 = vcmask 261120  }
  0x39   :  { %2353 = vmatprep.subr.bf16.mxu0 %v2557_v1  ;;  %2355 = vmatprep.mubr.msk.bf16.mxu0 %vm154_vm1, %v2558_v2  ;;  %v2908_v4 = vld [vmem:[%s3518_s2] sm:$0xff]   ;;  %v2923_v6 = vld [vmem:[%s3518_s2 + $0x8] sm:$0xff]   ;;  %v2562_v7 = vld [vmem:[%s3516_s0 + $0x18] sm:$0xff]   ;;  %v77_v37 = vand.u32 127, %v76_v33 }
  0x3a   :  { %2354 = vmatpush3.bf16.msra.mxu0 %v2557_v1  ;;  %2388 = vmatpush3.bf16.msra.mxu1 %v2908_v4  ;;  %v2563_v8 = vld [vmem:[%s3516_s0 + $0x20] sm:$0xff]   ;;  %v2564_v9 = vld [vmem:[%s3516_s0 + $0x28] sm:$0xff]   ;;  %v2566_v10 = vld [vmem:[%s3516_s0 + $0x30] sm:$0xff]  }
  0x3b   :  { %2371 = vmatprep.subr.bf16.mxu0 %v2785_v0  ;;  %2389 = vmatprep.subr.bf16.mxu1 %v2785_v0  ;;  %v2567_v11 = vld [vmem:[%s3516_s0 + $0x38] sm:$0xff]   ;;  %v2214_v13 = vld [vmem:[%s3519_s3] ss:$0 sm:$0xff]  ;;  %vm78_vm2 = vcmp.ge.s32.totalorder %v77_v37, 64  ;;  %vm79_vm3 = vcmp.lt.s32.totalorder %v77_v37, 96  ;;  %s2789_s3 = smov 32  }
  0x3c   :  { %vm2989_vm4 = vmand %vm78_vm2, %vm79_vm3 }
  0x3d   :  { %2356 = vmatmul.mubr.msk.bf16.vlgmr.msra.gmra.mrb[0].mxu0 %vm154_vm1, %v2559_v3  ;;  %v2995_v49 = vsel %vm2989_vm4, 1.0, %v2788_v48  ;;  %v3001_v60 = vsel %vm2989_vm4, 0.0, %v2788_v48 }
  0x3e   :  { %2372 = vmatpush3.bf16.msra.mxu0 %v2908_v4  ;;  %2359 = vmatprep.mubr.msk.bf16.mxu0 %vm154_vm1, %v2561_v5 }
  0x3f   :  { %2373 = vmatprep.subr.bf16.mxu0 %v2785_v0  ;;  %2390 = vmatpush3.bf16.msra.mxu1 %v2923_v6 }
  0x40   :  { %2395 = vmatprep.subr.bf16.mxu1 %v2785_v0 }
  0x42   :  { %2374 = vmatpush3.bf16.msra.mxu0 %v2923_v6 }
  0x43   :  { %2379 = vmatprep.subr.bf16.mxu0 %v2785_v0 }
  0x45   :  { %2360 = vmatmul.mubr.msk.bf16.gmra.mrb[4].mxu0 %vm154_vm1, %v2562_v7 }
  0x46   :  { %2363 = vmatprep.mubr.msk.bf16.mxu0 %vm154_vm1, %v2563_v8 }
  0x4d   :  { %2364 = vmatmul.mubr.msk.bf16.gmra.mrb[8].mxu0 %vm154_vm1, %v2564_v9 }
  0x4e   :  { %2367 = vmatprep.mubr.msk.bf16.mxu0 %vm154_vm1, %v2566_v10 }
  0x55   :  { %2368 = vmatmul.mubr.msk.bf16.gmra.mrb[12].mxu0 %vm154_vm1, %v2567_v11 }
  0x56   :  { %2375 = vmatprep.mubr.msk.bf16.mxu0 %vm2786_vm0, %v2785_v0 }
  0x5d   :  { %2376 = vmatmul.mubr.bf16.vlgmr.msra.gmra.mrb[16].mxu0 %v2787_v12 }
  0x5e   :  { %2380 = vmatpush3.bf16.msra.mxu0 %v2908_v4  ;;  %2383 = vmatprep.mubr.msk.bf16.mxu0 %vm2786_vm0, %v2785_v0 }
  0x5f   :  { %2381 = vmatprep.subr.bf16.mxu0 %v2785_v0 }
  0x62   :  { %2382 = vmatpush3.bf16.msra.mxu0 %v2923_v6 }
  0x63   :  { %2403 = vmatprep.subr.bf16.mxu0 %v2785_v0 }
 0x110   :  { %v2357_v14 = vpop.f32.mrb[0].mxu0 }
 0x111   :  { %v2961_v15 = vadd.f32 %v2357_v14, %v2214_v13  ;;  %v213_v16 = vpop.f32.mrb[1].mxu0 }
 0x112   :  { %v2358_v17 = vpop.f32.mrb[2].mxu0  ;;  %v214_v47 = vadd.f32 %v2214_v13, %v213_v16 }
 0x113   :  { %v2963_v18 = vadd.f32 %v2358_v17, %v2214_v13  ;;  %v216_v19 = vpop.f32.mrb[3].mxu0 }
 0x114   :  { %v217_v51 = vadd.f32 %v2214_v13, %v216_v19 }
 0x118   :  { %v2361_v20 = vpop.f32.mrb[4].mxu0 }
 0x119   :  { %v2965_v21 = vadd.f32 %v2361_v20, %v2214_v13  ;;  %v229_v22 = vpop.f32.mrb[5].mxu0 }
 0x11a   :  { %v2967_v23 = vadd.f32 %v2214_v13, %v229_v22  ;;  %v2362_v24 = vpop.f32.mrb[6].mxu0 }
 0x11b   :  { %v2969_v25 = vadd.f32 %v2362_v24, %v2214_v13  ;;  %v232_v26 = vpop.f32.mrb[7].mxu0 }
 0x11c   :  { %v2971_v27 = vadd.f32 %v2214_v13, %v232_v26 }
 0x120   :  { %v2365_v28 = vpop.f32.mrb[8].mxu0 }
 0x121   :  { %v2973_v29 = vadd.f32 %v2365_v28, %v2214_v13  ;;  %v245_v30 = vpop.f32.mrb[9].mxu0 }
 0x122   :  { %v2975_v31 = vadd.f32 %v2214_v13, %v245_v30  ;;  %v2366_v32 = vpop.f32.mrb[10].mxu0 }
 0x123   :  { %v2977_v34 = vadd.f32 %v2366_v32, %v2214_v13  ;;  %v248_v35 = vpop.f32.mrb[11].mxu0 }
 0x124   :  { %v2979_v36 = vadd.f32 %v2214_v13, %v248_v35 }
 0x128   :  { %v2369_v38 = vpop.f32.mrb[12].mxu0 }
 0x129   :  { %v2981_v39 = vadd.f32 %v2369_v38, %v2214_v13  ;;  %v261_v40 = vpop.f32.mrb[13].mxu0 }
 0x12a   :  { %v2983_v41 = vadd.f32 %v2214_v13, %v261_v40  ;;  %v2370_v42 = vpop.f32.mrb[14].mxu0 }
 0x12b   :  { %v2985_v43 = vadd.f32 %v2370_v42, %v2214_v13  ;;  %v264_v44 = vpop.f32.mrb[15].mxu0 }
 0x12c   :  { %v2987_v45 = vadd.f32 %v2214_v13, %v264_v44 }
 0x130   :  { %v348_v50 = vpop.f32.mrb[16].mxu0 }
 0x131   :  { %v355_v52 = vadd.f32 %v348_v50, %v214_v47  ;;  %v2377_v53 = vpop.f32.mrb[17].mxu0 }
 0x132   :  { %v351_v54 = vpop.f32.mrb[18].mxu0 }
 0x133   :  { %v357_v55 = vmul.f32 %v355_v52, %v2995_v49  ;;  %v356_v56 = vadd.f32 %v351_v54, %v217_v51  ;;  %v2378_v57 = vpop.f32.mrb[19].mxu0 }
 0x135   :  { %2582 = vtanh.f32 %v357_v55  ;;  %v358_v58 = vmul.f32 %v356_v56, %v2995_v49 }
 0x137   :  { %2584 = vtanh.f32 %v358_v58 }
 0x13f   :  { %v2583_v59 = vpop.eup %2582 }
 0x140   :  { %v361_v61 = vmul.f32 %v2583_v59, %v2995_v49 }
 0x141   :  { %v2585_v62 = vpop.eup %2584 }
 0x142   :  { %v363_v63 = vadd.f32 %v361_v61, %v3001_v60  ;;  %v362_v1 = vmul.f32 %v2585_v62, %v2995_v49 }
 0x144   :  { %369 = vrot.lane.b32.xlu0 %v363_v63, %s2782_s8  ;;  %v364_v2 = vadd.f32 %v362_v1, %v3001_v60  ;;  %v365_v9 = vmul.f32 0.0, %v363_v63 }
 0x146   :  { %v366_v13 = vmul.f32 0.0, %v364_v2 }
 0x148   :  { %371 = vrot.lane.b32.xlu0 %v364_v2, %s2782_s8 }
 0x1b6   :  { %v370_v3 = vpop.permute.xlu0 %369 }
 0x1b7   :  { %v375_v5 = vmul.f32 %v370_v3, %v363_v63 }
 0x1b9   :  { %379 = vrot.lane.b32.xlu1 %v375_v5, %s2789_s3 }
 0x1ba   :  { %v372_v7 = vpop.permute.xlu0 %371 }
 0x1bb   :  { %v376_v8 = vmul.f32 %v372_v7, %v364_v2 }
 0x1bd   :  { %381 = vrot.lane.b32.xlu1 %v376_v8, %s2789_s3 }
 0x22b   :  { %v380_v10 = vpop.permute.xlu1 %379 }
 0x22c   :  { %v385_v11 = vadd.f32 %v380_v10, %v365_v9 }
 0x22e   :  { %2586 = vtanh.f32 %v385_v11 }
 0x22f   :  { %v382_v14 = vpop.permute.xlu1 %381 }
 0x230   :  { %v386_v16 = vadd.f32 %v382_v14, %v366_v13 }
 0x232   :  { %2588 = vtanh.f32 %v386_v16 }
 0x238   :  { %v2587_v17 = vpop.eup %2586 }
 0x239   :  { %391 = vrot.lane.b32.xlu0 %v2587_v17, %s2782_s8 }
 0x23c   :  { %v2589_v19 = vpop.eup %2588 }
 0x23d   :  { %393 = vrot.lane.b32.xlu1 %v2589_v19, %s2782_s8 }
 0x2ab   :  { %v392_v20 = vpop.permute.xlu0 %391 }
 0x2ac   :  { %v397_v24 = vmul.f32 %v392_v20, %v363_v63 }
 0x2af   :  { %v394_v22 = vpop.permute.xlu1 %393 }
 0x2b0   :  { %v398_v26 = vmul.f32 %v394_v22, %v364_v2 }
 0x2b2   :  { %v399_v28 = vpack.c.bf16 %v398_v26, %v397_v24 }
 0x2b4   :  { %401 = vrot.lane.b32.xlu0 %v399_v28, %s2789_s3 }
 0x326   :  { %v402_v30 = vpop.permute.xlu0 %401 }
 0x327   :  { %404 = vst.msk [vmem:[#allocation2] sm:$0xff] %vm310_vm5, %v402_v30  ;;  %2384 = vmatmul.mubr.msk.bf16.vlgmr.msra.gmra.mrb[20].mxu0 %vm310_vm5, %v402_v30 }
 0x328   :  { %2404 = vmatpush3.bf16.msra.mxu0 %v2908_v4  ;;  %2407 = vmatprep.mubr.msk.bf16.mxu0 %vm2786_vm0, %v2785_v0 }
 0x329   :  { %2405 = vmatprep.subr.bf16.mxu0 %v2785_v0 }
 0x32c   :  { %2406 = vmatpush3.bf16.msra.mxu0 %v2923_v6 }
 0x32d   :  { %2419 = vmatprep.subr.bf16.mxu0 %v2785_v0 }
 0x3fa   :  { %v445_v32 = vpop.f32.mrb[20].mxu0 }
 0x3fb   :  { %v452_v33 = vadd.f32 %v445_v32, %v2961_v15  ;;  %v2385_v35 = vpop.f32.mrb[21].mxu0 }
 0x3fc   :  { %v448_v37 = vpop.f32.mrb[22].mxu0 }
 0x3fd   :  { %v454_v38 = vmul.f32 %v452_v33, %v2995_v49  ;;  %v453_v40 = vadd.f32 %v448_v37, %v2963_v18  ;;  %v2386_v42 = vpop.f32.mrb[23].mxu0 }
 0x3ff   :  { %2590 = vtanh.f32 %v454_v38  ;;  %v455_v44 = vmul.f32 %v453_v40, %v2995_v49 }
 0x401   :  { %2592 = vtanh.f32 %v455_v44 }
 0x409   :  { %v2591_v46 = vpop.eup %2590 }
 0x40a   :  { %v458_v47 = vmul.f32 %v2591_v46, %v2995_v49 }
 0x40b   :  { %v2593_v48 = vpop.eup %2592 }
 0x40c   :  { %v460_v50 = vadd.f32 %v458_v47, %v3001_v60  ;;  %v459_v51 = vmul.f32 %v2593_v48, %v2995_v49 }
 0x40e   :  { %466 = vrot.lane.b32.xlu1 %v460_v50, %s2782_s8  ;;  %v461_v15 = vadd.f32 %v459_v51, %v3001_v60  ;;  %v462_v55 = vmul.f32 %v460_v50, %v385_v11 }
 0x410   :  { %468 = vrot.lane.b32.xlu0 %v461_v15, %s2782_s8  ;;  %v463_v58 = vmul.f32 %v461_v15, %v386_v16 }
 0x480   :  { %v467_v18 = vpop.permute.xlu1 %466 }
 0x481   :  { %v472_v52 = vmul.f32 %v467_v18, %v460_v50 }
 0x482   :  { %v469_v53 = vpop.permute.xlu0 %468 }
 0x483   :  { %v473_v54 = vmul.f32 %v469_v53, %v461_v15  ;;  %476 = vrot.lane.b32.xlu1 %v472_v52, %s2789_s3 }
 0x485   :  { %478 = vrot.lane.b32.xlu0 %v473_v54, %s2789_s3 }
 0x4f5   :  { %v477_v56 = vpop.permute.xlu1 %476 }
 0x4f6   :  { %v482_v57 = vadd.f32 %v477_v56, %v462_v55 }
 0x4f7   :  { %v479_v59 = vpop.permute.xlu0 %478 }
 0x4f8   :  { %2594 = vtanh.f32 %v482_v57  ;;  %v483_v61 = vadd.f32 %v479_v59, %v463_v58 }
 0x4fa   :  { %2596 = vtanh.f32 %v483_v61 }
 0x502   :  { %v2595_v62 = vpop.eup %2594 }
 0x503   :  { %488 = vrot.lane.b32.xlu1 %v2595_v62, %s2782_s8 }
 0x504   :  { %v2597_v63 = vpop.eup %2596 }
 0x505   :  { %490 = vrot.lane.b32.xlu0 %v2597_v63, %s2782_s8 }
 0x575   :  { %v489_v1 = vpop.permute.xlu1 %488 }
 0x576   :  { %v494_v3 = vmul.f32 %v489_v1, %v460_v50 }
 0x577   :  { %v491_v2 = vpop.permute.xlu0 %490 }
 0x578   :  { %v495_v5 = vmul.f32 %v491_v2, %v461_v15 }
 0x57a   :  { %v496_v7 = vpack.c.bf16 %v495_v5, %v494_v3 }
 0x57c   :  { %498 = vrot.lane.b32.xlu1 %v496_v7, %s2789_s3 }
 0x5ee   :  { %v499_v8 = vpop.permute.xlu1 %498 }
 0x5ef   :  { %502 = vst.msk [vmem:[#allocation2 + $0x8] sm:$0xff] %vm310_vm5, %v499_v8  ;;  %2392 = vmatmul.mubr.msk.bf16.vlgmr.msra.gmra.mrb[0].mxu1 %vm310_vm5, %v499_v8 }
 0x5f0   :  { %2396 = vmatpush3.bf16.msra.mxu1 %v2908_v4  ;;  %2399 = vmatprep.mubr.msk.bf16.mxu1 %vm2786_vm0, %v2785_v0 }
 0x5f1   :  { %2397 = vmatprep.subr.bf16.mxu1 %v2785_v0 }
 0x5f4   :  { %2398 = vmatpush3.bf16.msra.mxu1 %v2923_v6 }
 0x5f5   :  { %2411 = vmatprep.subr.bf16.mxu1 %v2785_v0 }
 0x6c2   :  { %v543_v9 = vpop.f32.mrb[0].mxu1 }
 0x6c3   :  { %v550_v10 = vadd.f32 %v543_v9, %v2967_v23  ;;  %v2393_v11 = vpop.f32.mrb[1].mxu1 }
 0x6c4   :  { %v546_v13 = vpop.f32.mrb[2].mxu1 }
 0x6c5   :  { %v552_v14 = vmul.f32 %v550_v10, %v2995_v49  ;;  %v551_v16 = vadd.f32 %v546_v13, %v2971_v27  ;;  %v2394_v17 = vpop.f32.mrb[3].mxu1 }
 0x6c7   :  { %2598 = vtanh.f32 %v552_v14  ;;  %v553_v19 = vmul.f32 %v551_v16, %v2995_v49 }
 0x6c9   :  { %2600 = vtanh.f32 %v553_v19 }
 0x6d1   :  { %v2599_v20 = vpop.eup %2598 }
 0x6d2   :  { %v556_v22 = vmul.f32 %v2599_v20, %v2995_v49 }
 0x6d3   :  { %v2601_v24 = vpop.eup %2600 }
 0x6d4   :  { %v558_v26 = vadd.f32 %v556_v22, %v3001_v60  ;;  %v557_v28 = vmul.f32 %v2601_v24, %v2995_v49 }
 0x6d6   :  { %564 = vrot.lane.b32.xlu0 %v558_v26, %s2782_s8  ;;  %v559_v23 = vadd.f32 %v557_v28, %v3001_v60  ;;  %v560_v35 = vmul.f32 %v558_v26, %v482_v57 }
 0x6d8   :  { %566 = vrot.lane.b32.xlu1 %v559_v23, %s2782_s8  ;;  %v561_v40 = vmul.f32 %v559_v23, %v483_v61 }
 0x748   :  { %v565_v27 = vpop.permute.xlu0 %564 }
 0x749   :  { %v570_v30 = vmul.f32 %v565_v27, %v558_v26 }
 0x74a   :  { %v567_v32 = vpop.permute.xlu1 %566 }
 0x74b   :  { %v571_v33 = vmul.f32 %v567_v32, %v559_v23  ;;  %574 = vrot.lane.b32.xlu0 %v570_v30, %s2789_s3 }
 0x74d   :  { %576 = vrot.lane.b32.xlu1 %v571_v33, %s2789_s3 }
 0x7bd   :  { %v575_v37 = vpop.permute.xlu0 %574 }
 0x7be   :  { %v580_v38 = vadd.f32 %v575_v37, %v560_v35 }
 0x7bf   :  { %v577_v42 = vpop.permute.xlu1 %576 }
 0x7c0   :  { %2602 = vtanh.f32 %v580_v38  ;;  %v581_v44 = vadd.f32 %v577_v42, %v561_v40 }
 0x7c2   :  { %2604 = vtanh.f32 %v581_v44 }
 0x7ca   :  { %v2603_v46 = vpop.eup %2602 }
 0x7cb   :  { %586 = vrot.lane.b32.xlu0 %v2603_v46, %s2782_s8 }
 0x7cc   :  { %v2605_v47 = vpop.eup %2604 }
 0x7cd   :  { %588 = vrot.lane.b32.xlu1 %v2605_v47, %s2782_s8 }
 0x83d   :  { %v587_v48 = vpop.permute.xlu0 %586 }
 0x83e   :  { %v592_v51 = vmul.f32 %v587_v48, %v558_v26 }
 0x83f   :  { %v589_v50 = vpop.permute.xlu1 %588 }
 0x840   :  { %v593_v15 = vmul.f32 %v589_v50, %v559_v23 }
 0x842   :  { %v594_v18 = vpack.c.bf16 %v593_v15, %v592_v51 }
 0x844   :  { %596 = vrot.lane.b32.xlu0 %v594_v18, %s2789_s3 }
 0x8b6   :  { %v597_v52 = vpop.permute.xlu0 %596 }
 0x8b7   :  { %600 = vst.msk [vmem:[#allocation2 + $0x10] sm:$0xff] %vm310_vm5, %v597_v52  ;;  %2400 = vmatmul.mubr.msk.bf16.vlgmr.msra.gmra.mrb[4].mxu1 %vm310_vm5, %v597_v52 }
 0x8b8   :  { %2412 = vmatpush3.bf16.msra.mxu1 %v2908_v4  ;;  %2415 = vmatprep.mubr.msk.bf16.mxu1 %vm2786_vm0, %v2785_v0 }
 0x8b9   :  { %2413 = vmatprep.subr.bf16.mxu1 %v2785_v0 }
 0x8bc   :  { %2414 = vmatpush3.bf16.msra.mxu1 %v2923_v6 }
 0x8bd   :  { %2427 = vmatprep.subr.bf16.mxu1 %v2785_v0 }
 0x98a   :  { %v641_v53 = vpop.f32.mrb[4].mxu1 }
 0x98b   :  { %v648_v54 = vadd.f32 %v641_v53, %v2965_v21  ;;  %v2401_v55 = vpop.f32.mrb[5].mxu1 }
 0x98c   :  { %v644_v56 = vpop.f32.mrb[6].mxu1 }
 0x98d   :  { %v650_v57 = vmul.f32 %v648_v54, %v2995_v49  ;;  %v649_v58 = vadd.f32 %v644_v56, %v2969_v25  ;;  %v2402_v59 = vpop.f32.mrb[7].mxu1 }
 0x98f   :  { %2606 = vtanh.f32 %v650_v57  ;;  %v651_v61 = vmul.f32 %v649_v58, %v2995_v49 }
 0x991   :  { %2608 = vtanh.f32 %v651_v61 }
 0x999   :  { %v2607_v62 = vpop.eup %2606 }
 0x99a   :  { %v654_v63 = vmul.f32 %v2607_v62, %v2995_v49 }
 0x99b   :  { %v2609_v1 = vpop.eup %2608 }
 0x99c   :  { %v656_v2 = vadd.f32 %v654_v63, %v3001_v60  ;;  %v655_v3 = vmul.f32 %v2609_v1, %v2995_v49 }
 0x99e   :  { %662 = vrot.lane.b32.xlu1 %v656_v2, %s2782_s8  ;;  %v657_v21 = vadd.f32 %v655_v3, %v3001_v60  ;;  %v658_v9 = vmul.f32 %v656_v2, %v580_v38 }
 0x9a0   :  { %664 = vrot.lane.b32.xlu0 %v657_v21, %s2782_s8  ;;  %v659_v13 = vmul.f32 %v657_v21, %v581_v44 }
 0xa10   :  { %v663_v25 = vpop.permute.xlu1 %662 }
 0xa11   :  { %v668_v5 = vmul.f32 %v663_v25, %v656_v2 }
 0xa12   :  { %v665_v7 = vpop.permute.xlu0 %664 }
 0xa13   :  { %v669_v8 = vmul.f32 %v665_v7, %v657_v21  ;;  %672 = vrot.lane.b32.xlu1 %v668_v5, %s2789_s3 }
 0xa15   :  { %674 = vrot.lane.b32.xlu0 %v669_v8, %s2789_s3 }
 0xa85   :  { %v673_v10 = vpop.permute.xlu1 %672 }
 0xa86   :  { %v678_v11 = vadd.f32 %v673_v10, %v658_v9 }
 0xa87   :  { %v675_v14 = vpop.permute.xlu0 %674 }
 0xa88   :  { %2610 = vtanh.f32 %v678_v11  ;;  %v679_v16 = vadd.f32 %v675_v14, %v659_v13 }
 0xa8a   :  { %2612 = vtanh.f32 %v679_v16 }
 0xa92   :  { %v2611_v17 = vpop.eup %2610 }
 0xa93   :  { %684 = vrot.lane.b32.xlu1 %v2611_v17, %s2782_s8 }
 0xa94   :  { %v2613_v19 = vpop.eup %2612 }
 0xa95   :  { %686 = vrot.lane.b32.xlu0 %v2613_v19, %s2782_s8 }
 0xb05   :  { %v685_v20 = vpop.permute.xlu1 %684 }
 0xb06   :  { %v690_v24 = vmul.f32 %v685_v20, %v656_v2 }
 0xb07   :  { %v687_v22 = vpop.permute.xlu0 %686 }
 0xb08   :  { %v691_v26 = vmul.f32 %v687_v22, %v657_v21 }
 0xb0a   :  { %v692_v28 = vpack.c.bf16 %v691_v26, %v690_v24 }
 0xb0c   :  { %694 = vrot.lane.b32.xlu1 %v692_v28, %s2789_s3 }
 0xb7e   :  { %v695_v23 = vpop.permute.xlu1 %694 }
 0xb7f   :  { %698 = vst.msk [vmem:[#allocation2 + $0x18] sm:$0xff] %vm310_vm5, %v695_v23  ;;  %2408 = vmatmul.mubr.msk.bf16.vlgmr.msra.gmra.mrb[24].mxu0 %vm310_vm5, %v695_v23 }
 0xb80   :  { %2420 = vmatpush3.bf16.msra.mxu0 %v2908_v4  ;;  %2423 = vmatprep.mubr.msk.bf16.mxu0 %vm2786_vm0, %v2785_v0 }
 0xb81   :  { %2421 = vmatprep.subr.bf16.mxu0 %v2785_v0 }
 0xb84   :  { %2422 = vmatpush3.bf16.msra.mxu0 %v2923_v6 }
 0xc52   :  { %v739_v27 = vpop.f32.mrb[24].mxu0 }
 0xc53   :  { %v746_v30 = vadd.f32 %v739_v27, %v2975_v31  ;;  %v2409_v32 = vpop.f32.mrb[25].mxu0 }
 0xc54   :  { %v742_v33 = vpop.f32.mrb[26].mxu0  ;;  %v2568_v32 = vld [vmem:[%s3520_s4] sm:$0xff]  }
 0xc55   :  { %v748_v35 = vmul.f32 %v746_v30, %v2995_v49  ;;  %v747_v37 = vadd.f32 %v742_v33, %v2979_v36  ;;  %v2410_v38 = vpop.f32.mrb[27].mxu0  ;;  %2435 = vmatprep.subr.bf16.mxu0 %v2568_v32 }
 0xc57   :  { %2614 = vtanh.f32 %v748_v35  ;;  %v749_v40 = vmul.f32 %v747_v37, %v2995_v49 }
 0xc59   :  { %2616 = vtanh.f32 %v749_v40 }
 0xc61   :  { %v2615_v42 = vpop.eup %2614 }
 0xc62   :  { %v752_v44 = vmul.f32 %v2615_v42, %v2995_v49  ;;  %v2569_v42 = vld [vmem:[%s3520_s4 + $0x8] sm:$0xff]  }
 0xc63   :  { %v2617_v46 = vpop.eup %2616 }
 0xc64   :  { %v754_v47 = vadd.f32 %v752_v44, %v3001_v60  ;;  %v753_v48 = vmul.f32 %v2617_v46, %v2995_v49  ;;  %v1091_v46 = vld [vmem:[#allocation2] sm:$0xff] }
 0xc66   :  { %760 = vrot.lane.b32.xlu0 %v754_v47, %s2782_s8  ;;  %v755_v31 = vadd.f32 %v753_v48, %v3001_v60  ;;  %v756_v18 = vmul.f32 %v754_v47, %v678_v11  ;;  %v1093_v48 = vld [vmem:[#allocation2 + $0x10] sm:$0xff] }
 0xc68   :  { %762 = vrot.lane.b32.xlu1 %v755_v31, %s2782_s8  ;;  %v757_v54 = vmul.f32 %v755_v31, %v679_v16 }
 0xcd8   :  { %v761_v36 = vpop.permute.xlu0 %760 }
 0xcd9   :  { %v766_v50 = vmul.f32 %v761_v36, %v754_v47 }
 0xcda   :  { %v763_v51 = vpop.permute.xlu1 %762 }
 0xcdb   :  { %v767_v15 = vmul.f32 %v763_v51, %v755_v31  ;;  %770 = vrot.lane.b32.xlu0 %v766_v50, %s2789_s3 }
 0xcdd   :  { %772 = vrot.lane.b32.xlu1 %v767_v15, %s2789_s3 }
 0xd4d   :  { %v771_v52 = vpop.permute.xlu0 %770 }
 0xd4e   :  { %v776_v53 = vadd.f32 %v771_v52, %v756_v18 }
 0xd4f   :  { %v773_v55 = vpop.permute.xlu1 %772 }
 0xd50   :  { %2618 = vtanh.f32 %v776_v53  ;;  %v777_v56 = vadd.f32 %v773_v55, %v757_v54 }
 0xd52   :  { %2620 = vtanh.f32 %v777_v56 }
 0xd5a   :  { %v2619_v57 = vpop.eup %2618 }
 0xd5b   :  { %782 = vrot.lane.b32.xlu0 %v2619_v57, %s2782_s8 }
 0xd5c   :  { %v2621_v58 = vpop.eup %2620 }
 0xd5d   :  { %784 = vrot.lane.b32.xlu1 %v2621_v58, %s2782_s8 }
 0xdcd   :  { %v783_v59 = vpop.permute.xlu0 %782 }
 0xdce   :  { %v788_v62 = vmul.f32 %v783_v59, %v754_v47  ;;  %v1092_v47 = vld [vmem:[#allocation2 + $0x8] sm:$0xff] }
 0xdcf   :  { %v785_v61 = vpop.permute.xlu1 %784 }
 0xdd0   :  { %v789_v63 = vmul.f32 %v785_v61, %v755_v31  ;;  %v1094_v31 = vld [vmem:[#allocation2 + $0x18] sm:$0xff] }
 0xdd2   :  { %v790_v1 = vpack.c.bf16 %v789_v63, %v788_v62 }
 0xdd4   :  { %792 = vrot.lane.b32.xlu0 %v790_v1, %s2789_s3 }
 0xe46   :  { %v793_v2 = vpop.permute.xlu0 %792 }
 0xe47   :  { %796 = vst.msk [vmem:[#allocation2 + $0x20] sm:$0xff] %vm310_vm5, %v793_v2  ;;  %2416 = vmatmul.mubr.msk.bf16.vlgmr.msra.gmra.mrb[8].mxu1 %vm310_vm5, %v793_v2 }
 0xe48   :  { %2428 = vmatpush3.bf16.msra.mxu1 %v2908_v4  ;;  %2431 = vmatprep.mubr.msk.bf16.mxu1 %vm2786_vm0, %v2785_v0 }
 0xe49   :  { %2429 = vmatprep.subr.bf16.mxu1 %v2785_v0 }
 0xe4c   :  { %2430 = vmatpush3.bf16.msra.mxu1 %v2923_v6 }
 0xe4d   :  { %2455 = vmatprep.subr.bf16.mxu1 %v2785_v0 }
 0xe4e   :  { %v1095_v36 = vld [vmem:[#allocation2 + $0x20] sm:$0xff] }
 0xf1a   :  { %v837_v3 = vpop.f32.mrb[8].mxu1 }
 0xf1b   :  { %v844_v21 = vadd.f32 %v837_v3, %v2973_v29  ;;  %v2417_v25 = vpop.f32.mrb[9].mxu1 }
 0xf1c   :  { %v840_v5 = vpop.f32.mrb[10].mxu1 }
 0xf1d   :  { %v846_v7 = vmul.f32 %v844_v21, %v2995_v49  ;;  %v845_v8 = vadd.f32 %v840_v5, %v2977_v34  ;;  %v2418_v9 = vpop.f32.mrb[11].mxu1 }
 0xf1f   :  { %2622 = vtanh.f32 %v846_v7  ;;  %v847_v4 = vmul.f32 %v845_v8, %v2995_v49 }
 0xf21   :  { %2624 = vtanh.f32 %v847_v4 }
 0xf29   :  { %v2623_v10 = vpop.eup %2622 }
 0xf2a   :  { %v850_v11 = vmul.f32 %v2623_v10, %v2995_v49 }
 0xf2b   :  { %v2625_v6 = vpop.eup %2624 }
 0xf2c   :  { %v852_v13 = vadd.f32 %v850_v11, %v3001_v60  ;;  %v851_v14 = vmul.f32 %v2625_v6, %v2995_v49 }
 0xf2e   :  { %858 = vrot.lane.b32.xlu1 %v852_v13, %s2782_s8  ;;  %v853_v29 = vadd.f32 %v851_v14, %v3001_v60  ;;  %v854_v20 = vmul.f32 %v852_v13, %v776_v53 }
 0xf30   :  { %860 = vrot.lane.b32.xlu0 %v853_v29, %s2782_s8  ;;  %v855_v26 = vmul.f32 %v853_v29, %v777_v56 }
 0xfa0   :  { %v859_v34 = vpop.permute.xlu1 %858 }
 0xfa1   :  { %v864_v16 = vmul.f32 %v859_v34, %v852_v13 }
 0xfa2   :  { %v861_v17 = vpop.permute.xlu0 %860 }
 0xfa3   :  { %v865_v19 = vmul.f32 %v861_v17, %v853_v29  ;;  %868 = vrot.lane.b32.xlu1 %v864_v16, %s2789_s3 }
 0xfa5   :  { %870 = vrot.lane.b32.xlu0 %v865_v19, %s2789_s3 }
0x1015   :  { %v869_v22 = vpop.permute.xlu1 %868 }
0x1016   :  { %v3125_v24 = vadd.f32 %v869_v22, %v854_v20 }
0x1017   :  { %v871_v28 = vpop.permute.xlu0 %870 }
0x1018   :  { %2626 = vtanh.f32 %v3125_v24  ;;  %v3128_v23 = vadd.f32 %v871_v28, %v855_v26  ;;  %v3205_v26 = vld [vmem:[%s3521_s5 + $0x8] sm:$0xff]  }
0x101a   :  { %2628 = vtanh.f32 %v3128_v23 }
0x1022   :  { %v2627_v27 = vpop.eup %2626 }
0x1023   :  { %880 = vrot.lane.b32.xlu1 %v2627_v27, %s2782_s8 }
0x1024   :  { %v2629_v30 = vpop.eup %2628 }
0x1025   :  { %882 = vrot.lane.b32.xlu0 %v2629_v30, %s2782_s8 }
0x1095   :  { %v881_v33 = vpop.permute.xlu1 %880 }
0x1096   :  { %v886_v37 = vmul.f32 %v881_v33, %v852_v13 }
0x1097   :  { %v883_v35 = vpop.permute.xlu0 %882 }
0x1098   :  { %v887_v38 = vmul.f32 %v883_v35, %v853_v29 }
0x109a   :  { %v888_v40 = vpack.c.bf16 %v887_v38, %v886_v37 }
0x109c   :  { %890 = vrot.lane.b32.xlu1 %v888_v40, %s2789_s3 }
0x110e   :  { %v891_v44 = vpop.permute.xlu1 %890 }
0x110f   :  { %894 = vst.msk [vmem:[#allocation2 + $0x28] sm:$0xff] %vm310_vm5, %v891_v44  ;;  %2424 = vmatmul.mubr.msk.bf16.vlgmr.msra.gmra.mrb[28].mxu0 %vm310_vm5, %v891_v44 }
0x1110   :  { %2436 = vmatpush3.bf16.msra.mxu0 %v2568_v32  ;;  %2439 = vmatprep.mubr.msk.bf16.mxu0 %vm310_vm5, %v1091_v46  ;;  %v3235_v46 = vld [vmem:[%s3522_s6] ss:$0 sm:$0xff] }
0x1111   :  { %2437 = vmatprep.subr.bf16.mxu0 %v2569_v42 }
0x1114   :  { %2438 = vmatpush3.bf16.msra.mxu0 %v2569_v42 }
0x1115   :  { %2487 = vmatprep.subr.bf16.mxu0 %v2785_v0 }
0x1116   :  { %v1096_v50 = vld [vmem:[#allocation2 + $0x28] sm:$0xff] }
0x1117   :  { %2440 = vmatmul.mubr.msk.bf16.vlgmr.msra.gmra.mrb[32].mxu0 %vm310_vm5, %v1092_v47 }
0x1118   :  { %2443 = vmatprep.mubr.msk.bf16.mxu0 %vm310_vm5, %v1093_v48 }
0x111f   :  { %2444 = vmatmul.mubr.msk.bf16.gmra.mrb[36].mxu0 %vm310_vm5, %v1094_v31 }
0x1120   :  { %2447 = vmatprep.mubr.msk.bf16.mxu0 %vm310_vm5, %v1095_v36 }
0x1127   :  { %2448 = vmatmul.mubr.msk.bf16.gmra.mrb[40].mxu0 %vm310_vm5, %v1096_v50 }
0x11e2   :  { %v935_v51 = vpop.f32.mrb[28].mxu0 }
0x11e3   :  { %v942_v15 = vadd.f32 %v935_v51, %v2983_v41  ;;  %v2425_v18 = vpop.f32.mrb[29].mxu0 }
0x11e4   :  { %v938_v52 = vpop.f32.mrb[30].mxu0 }
0x11e5   :  { %v944_v53 = vmul.f32 %v942_v15, %v2995_v49  ;;  %v943_v54 = vadd.f32 %v938_v52, %v2987_v45  ;;  %v2426_v55 = vpop.f32.mrb[31].mxu0 }
0x11e7   :  { %2630 = vtanh.f32 %v944_v53  ;;  %v945_v56 = vmul.f32 %v943_v54, %v2995_v49 }
0x11e9   :  { %2632 = vtanh.f32 %v945_v56 }
0x11ea   :  { %v3153_v57 = vpop.f32.mrb[32].mxu0 }
0x11eb   :  { %v3155_v58 = vpop.f32.mrb[33].mxu0 }
0x11ec   :  { %v3157_v59 = vpop.f32.mrb[34].mxu0  ;;  %v1181_v47 = vadd.f32 %v3235_v46, %v3155_v58 }
0x11ed   :  { %v3159_v61 = vpop.f32.mrb[35].mxu0 }
0x11ee   :  { %v1184_v31 = vadd.f32 %v3235_v46, %v3159_v61 }
0x11f1   :  { %v2631_v41 = vpop.eup %2630 }
0x11f2   :  { %v3161_v62 = vpop.f32.mrb[36].mxu0  ;;  %v948_v63 = vmul.f32 %v2631_v41, %v2995_v49 }
0x11f3   :  { %v2633_v1 = vpop.eup %2632  ;;  %v3164_v45 = vpop.f32.mrb[37].mxu0 }
0x11f4   :  { %v3166_v2 = vpop.f32.mrb[38].mxu0  ;;  %v950_v3 = vadd.f32 %v948_v63, %v3001_v60  ;;  %v949_v21 = vmul.f32 %v2633_v1, %v2995_v49 }
0x11f5   :  { %v3170_v25 = vpop.f32.mrb[39].mxu0 }
0x11f6   :  { %956 = vrot.lane.b32.xlu0 %v950_v3, %s2782_s8  ;;  %v951_v5 = vadd.f32 %v949_v21, %v3001_v60  ;;  %v952_v14 = vmul.f32 %v950_v3, %v3125_v24  ;;  %v3198_v24 = vld [vmem:[%s3521_s5] sm:$0xff]  }
0x11f7   :  { %2488 = vmatpush3.bf16.msra.mxu0 %v3198_v24 }
0x11f8   :  { %958 = vrot.lane.b32.xlu1 %v951_v5, %s2782_s8  ;;  %v953_v16 = vmul.f32 %v951_v5, %v3128_v23  ;;  %2489 = vmatprep.subr.bf16.mxu0 %v2785_v0 }
0x11fa   :  { %v3175_v7 = vpop.f32.mrb[40].mxu0 }
0x11fb   :  { %v3177_v8 = vpop.f32.mrb[41].mxu0  ;;  %2490 = vmatpush3.bf16.msra.mxu0 %v3205_v26 }
0x11fc   :  { %v3179_v9 = vpop.f32.mrb[42].mxu0  ;;  %2503 = vmatprep.subr.bf16.mxu0 %v2785_v0 }
0x11fd   :  { %v3181_v4 = vpop.f32.mrb[43].mxu0 }
0x1268   :  { %v957_v10 = vpop.permute.xlu0 %956 }
0x1269   :  { %v962_v11 = vmul.f32 %v957_v10, %v950_v3 }
0x126a   :  { %v959_v6 = vpop.permute.xlu1 %958 }
0x126b   :  { %v963_v13 = vmul.f32 %v959_v6, %v951_v5  ;;  %966 = vrot.lane.b32.xlu0 %v962_v11, %s2789_s3 }
0x126d   :  { %968 = vrot.lane.b32.xlu1 %v963_v13, %s2789_s3 }
0x12dd   :  { %v967_v29 = vpop.permute.xlu0 %966 }
0x12de   :  { %v3186_v34 = vadd.f32 %v967_v29, %v952_v14 }
0x12df   :  { %v969_v17 = vpop.permute.xlu1 %968 }
0x12e0   :  { %2634 = vtanh.f32 %v3186_v34  ;;  %v3190_v19 = vadd.f32 %v969_v17, %v953_v16 }
0x12e2   :  { %2636 = vtanh.f32 %v3190_v19 }
0x12ea   :  { %v2635_v20 = vpop.eup %2634 }
0x12eb   :  { %978 = vrot.lane.b32.xlu0 %v2635_v20, %s2782_s8 }
0x12ec   :  { %v2637_v22 = vpop.eup %2636 }
0x12ed   :  { %980 = vrot.lane.b32.xlu1 %v2637_v22, %s2782_s8 }
0x135d   :  { %v979_v28 = vpop.permute.xlu0 %978 }
0x135e   :  { %v984_v27 = vmul.f32 %v979_v28, %v950_v3 }
0x135f   :  { %v981_v23 = vpop.permute.xlu1 %980 }
0x1360   :  { %v985_v30 = vmul.f32 %v981_v23, %v951_v5  ;;  %v1189_v23 = vadd.f32 %v3153_v57, %v3235_v46 }
0x1362   :  { %v986_v32 = vpack.c.bf16 %v985_v30, %v984_v27  ;;  %v1192_v30 = vadd.f32 %v3157_v59, %v3235_v46 }
0x1364   :  { %988 = vrot.lane.b32.xlu0 %v986_v32, %s2789_s3 }
0x13d6   :  { %v989_v33 = vpop.permute.xlu0 %988 }
0x13d7   :  { %992 = vst.msk [vmem:[#allocation2 + $0x30] sm:$0xff] %vm310_vm5, %v989_v33  ;;  %2432 = vmatmul.mubr.msk.bf16.vlgmr.msra.gmra.mrb[12].mxu1 %vm310_vm5, %v989_v33 }
0x13d8   :  { %2456 = vmatpush3.bf16.msra.mxu1 %v3198_v24  ;;  %2459 = vmatprep.mubr.msk.bf16.mxu1 %vm2786_vm0, %v2785_v0 }
0x13d9   :  { %2457 = vmatprep.subr.bf16.mxu1 %v2785_v0 }
0x13dc   :  { %2458 = vmatpush3.bf16.msra.mxu1 %v3205_v26 }
0x13dd   :  { %2463 = vmatprep.subr.bf16.mxu1 %v2785_v0 }
0x13de   :  { %v1097_v35 = vld [vmem:[#allocation2 + $0x30] sm:$0xff] }
0x13df   :  { %2451 = vmatprep.mubr.msk.bf16.mxu0 %vm310_vm5, %v1097_v35  ;;  %2460 = vmatmul.mubr.bf16.vlgmr.msra.gmra.mrb[16].mxu1 %v2787_v12 }
0x13e0   :  { %2464 = vmatpush3.bf16.msra.mxu1 %v3198_v24  ;;  %2467 = vmatprep.mubr.msk.bf16.mxu1 %vm2786_vm0, %v2785_v0 }
0x13e1   :  { %2465 = vmatprep.subr.bf16.mxu1 %v2785_v0 }
0x13e4   :  { %2466 = vmatpush3.bf16.msra.mxu1 %v3205_v26 }
0x13e5   :  { %2471 = vmatprep.subr.bf16.mxu1 %v2785_v0 }
0x14aa   :  { %v1033_v37 = vpop.f32.mrb[12].mxu1 }
0x14ab   :  { %v3227_v38 = vadd.f32 %v1033_v37, %v2981_v39  ;;  %v2433_v40 = vpop.f32.mrb[13].mxu1 }
0x14ac   :  { %v1036_v42 = vpop.f32.mrb[14].mxu1 }
0x14ad   :  { %v3230_v44 = vadd.f32 %v1036_v42, %v2985_v43  ;;  %v2434_v12 = vpop.f32.mrb[15].mxu1 }
0x14b2   :  { %v1311_v48 = vpop.f32.mrb[16].mxu1 }
0x14b3   :  { %v1318_v39 = vadd.f32 %v1311_v48, %v1181_v47  ;;  %v2461_v36 = vpop.f32.mrb[17].mxu1 }
0x14b4   :  { %v1314_v50 = vpop.f32.mrb[18].mxu1 }
0x14b5   :  { %v1320_v51 = vmul.f32 %v1318_v39, %v2995_v49  ;;  %v1319_v43 = vadd.f32 %v1314_v50, %v1184_v31  ;;  %v2462_v15 = vpop.f32.mrb[19].mxu1 }
0x14b7   :  { %2638 = vtanh.f32 %v1320_v51  ;;  %v1321_v18 = vmul.f32 %v1319_v43, %v2995_v49 }
0x14b9   :  { %2640 = vtanh.f32 %v1321_v18 }
0x14c1   :  { %v2639_v52 = vpop.eup %2638 }
0x14c2   :  { %v1324_v53 = vmul.f32 %v2639_v52, %v2995_v49 }
0x14c3   :  { %v2641_v54 = vpop.eup %2640 }
0x14c4   :  { %v1326_v55 = vadd.f32 %v1324_v53, %v3001_v60  ;;  %v1325_v56 = vmul.f32 %v2641_v54, %v2995_v49 }
0x14c6   :  { %1332 = vrot.lane.b32.xlu1 %v1326_v55, %s2782_s8  ;;  %v1327_v58 = vadd.f32 %v1325_v56, %v3001_v60  ;;  %v1328_v3 = vmul.f32 0.0, %v1326_v55 }
0x14c8   :  { %1334 = vrot.lane.b32.xlu0 %v1327_v58, %s2782_s8  ;;  %v1329_v10 = vmul.f32 0.0, %v1327_v58 }
0x1538   :  { %v1333_v61 = vpop.permute.xlu1 %1332 }
0x1539   :  { %v1338_v41 = vmul.f32 %v1333_v61, %v1326_v55 }
0x153a   :  { %v1335_v63 = vpop.permute.xlu0 %1334 }
0x153b   :  { %v1339_v1 = vmul.f32 %v1335_v63, %v1327_v58  ;;  %1342 = vrot.lane.b32.xlu1 %v1338_v41, %s2789_s3 }
0x153d   :  { %1344 = vrot.lane.b32.xlu0 %v1339_v1, %s2789_s3 }
0x15ad   :  { %v1343_v21 = vpop.permute.xlu1 %1342 }
0x15ae   :  { %v1348_v5 = vadd.f32 %v1343_v21, %v1328_v3 }
0x15af   :  { %v1345_v11 = vpop.permute.xlu0 %1344 }
0x15b0   :  { %2642 = vtanh.f32 %v1348_v5  ;;  %v1349_v6 = vadd.f32 %v1345_v11, %v1329_v10  ;;  %v1200_v11 = vadd.f32 %v3235_v46, %v3170_v25 }
0x15b2   :  { %2644 = vtanh.f32 %v1349_v6 }
0x15ba   :  { %v2643_v13 = vpop.eup %2642 }
0x15bb   :  { %1354 = vrot.lane.b32.xlu1 %v2643_v13, %s2782_s8 }
0x15bc   :  { %v2645_v14 = vpop.eup %2644 }
0x15bd   :  { %1356 = vrot.lane.b32.xlu0 %v2645_v14, %s2782_s8 }
0x162d   :  { %v1355_v29 = vpop.permute.xlu1 %1354 }
0x162e   :  { %v1360_v17 = vmul.f32 %v1355_v29, %v1326_v55 }
0x162f   :  { %v1357_v16 = vpop.permute.xlu0 %1356 }
0x1630   :  { %v1361_v20 = vmul.f32 %v1357_v16, %v1327_v58 }
0x1632   :  { %v1364_v22 = vpack.c.bf16 %v1361_v20, %v1360_v17 }
0x1634   :  { %1366 = vrot.lane.b32.xlu1 %v1364_v22, %s2789_s3 }
0x16a6   :  { %v1367_v28 = vpop.permute.xlu1 %1366 }
0x16a7   :  { %2468 = vmatmul.mubr.msk.bf16.vlgmr.msra.gmra.mrb[20].mxu1 %vm310_vm5, %v1367_v28 }
0x16a8   :  { %2472 = vmatpush3.bf16.msra.mxu1 %v3198_v24  ;;  %2475 = vmatprep.mubr.msk.bf16.mxu1 %vm2786_vm0, %v2785_v0 }
0x16a9   :  { %2473 = vmatprep.subr.bf16.mxu1 %v2785_v0 }
0x16ac   :  { %2474 = vmatpush3.bf16.msra.mxu1 %v3205_v26 }
0x16ad   :  { %2479 = vmatprep.subr.bf16.mxu1 %v2785_v0 }
0x177a   :  { %v1405_v27 = vpop.f32.mrb[20].mxu1 }
0x177b   :  { %v1412_v32 = vadd.f32 %v1405_v27, %v1189_v23  ;;  %v2469_v33 = vpop.f32.mrb[21].mxu1 }
0x177c   :  { %v1408_v35 = vpop.f32.mrb[22].mxu1 }
0x177d   :  { %v1414_v37 = vmul.f32 %v1412_v32, %v2995_v49  ;;  %v1413_v40 = vadd.f32 %v1408_v35, %v1192_v30  ;;  %v2470_v42 = vpop.f32.mrb[23].mxu1 }
0x177f   :  { %2646 = vtanh.f32 %v1414_v37  ;;  %v1415_v12 = vmul.f32 %v1413_v40, %v2995_v49  ;;  %v1042_v37 = vmul.f32 %v3227_v38, %v2995_v49 }
0x1781   :  { %2648 = vtanh.f32 %v1415_v12 }
0x1789   :  { %v2647_v47 = vpop.eup %2646 }
0x178a   :  { %v1418_v48 = vmul.f32 %v2647_v47, %v2995_v49 }
0x178b   :  { %v2649_v31 = vpop.eup %2648 }
0x178c   :  { %v1420_v57 = vadd.f32 %v1418_v48, %v3001_v60  ;;  %v1419_v39 = vmul.f32 %v2649_v31, %v2995_v49 }
0x178e   :  { %1426 = vrot.lane.b32.xlu0 %v1420_v57, %s2782_s8  ;;  %v1421_v59 = vadd.f32 %v1419_v39, %v3001_v60  ;;  %v1422_v15 = vmul.f32 %v1420_v57, %v1348_v5  ;;  %v1197_v5 = vadd.f32 %v3235_v46, %v3164_v45 }
0x1790   :  { %1428 = vrot.lane.b32.xlu1 %v1421_v59, %s2782_s8  ;;  %v1423_v53 = vmul.f32 %v1421_v59, %v1349_v6 }
0x1800   :  { %v1427_v36 = vpop.permute.xlu0 %1426 }
0x1801   :  { %v1432_v50 = vmul.f32 %v1427_v36, %v1420_v57 }
0x1802   :  { %v1429_v51 = vpop.permute.xlu1 %1428 }
0x1803   :  { %v1433_v43 = vmul.f32 %v1429_v51, %v1421_v59  ;;  %1436 = vrot.lane.b32.xlu0 %v1432_v50, %s2789_s3  ;;  %v1043_v50 = vmul.f32 %v3230_v44, %v2995_v49  ;;  %v1205_v44 = vadd.f32 %v3161_v62, %v3235_v46 }
0x1805   :  { %1438 = vrot.lane.b32.xlu1 %v1433_v43, %s2789_s3 }
0x1875   :  { %v1437_v18 = vpop.permute.xlu0 %1436 }
0x1876   :  { %v1442_v52 = vadd.f32 %v1437_v18, %v1422_v15 }
0x1877   :  { %v1439_v54 = vpop.permute.xlu1 %1438 }
0x1878   :  { %2650 = vtanh.f32 %v1442_v52  ;;  %v1443_v55 = vadd.f32 %v1439_v54, %v1423_v53 }
0x187a   :  { %2652 = vtanh.f32 %v1443_v55 }
0x1882   :  { %v2651_v56 = vpop.eup %2650 }
0x1883   :  { %1448 = vrot.lane.b32.xlu0 %v2651_v56, %s2782_s8 }
0x1884   :  { %v2653_v58 = vpop.eup %2652 }
0x1885   :  { %1450 = vrot.lane.b32.xlu1 %v2653_v58, %s2782_s8 }
0x18f5   :  { %v1449_v61 = vpop.permute.xlu0 %1448 }
0x18f6   :  { %v1454_v63 = vmul.f32 %v1449_v61, %v1420_v57  ;;  %v1208_v61 = vadd.f32 %v3166_v2, %v3235_v46 }
0x18f7   :  { %v1451_v41 = vpop.permute.xlu1 %1450 }
0x18f8   :  { %v1455_v1 = vmul.f32 %v1451_v41, %v1421_v59 }
0x18fa   :  { %v1458_v3 = vpack.c.bf16 %v1455_v1, %v1454_v63 }
0x18fc   :  { %1460 = vrot.lane.b32.xlu0 %v1458_v3, %s2789_s3 }
0x196e   :  { %v1461_v21 = vpop.permute.xlu0 %1460 }
0x196f   :  { %2476 = vmatmul.mubr.msk.bf16.vlgmr.msra.gmra.mrb[24].mxu1 %vm310_vm5, %v1461_v21 }
0x1970   :  { %2480 = vmatpush3.bf16.msra.mxu1 %v3198_v24  ;;  %2483 = vmatprep.mubr.msk.bf16.mxu1 %vm2786_vm0, %v2785_v0 }
0x1971   :  { %2481 = vmatprep.subr.bf16.mxu1 %v2785_v0 }
0x1974   :  { %2482 = vmatpush3.bf16.msra.mxu1 %v3205_v26 }
0x1975   :  { %2495 = vmatprep.subr.bf16.mxu1 %v2785_v0 }
0x1a42   :  { %v1499_v10 = vpop.f32.mrb[24].mxu1 }
0x1a43   :  { %v1506_v6 = vadd.f32 %v1499_v10, %v1197_v5  ;;  %v2477_v13 = vpop.f32.mrb[25].mxu1 }
0x1a44   :  { %v1502_v14 = vpop.f32.mrb[26].mxu1 }
0x1a45   :  { %v1508_v29 = vmul.f32 %v1506_v6, %v2995_v49  ;;  %v1507_v16 = vadd.f32 %v1502_v14, %v1200_v11  ;;  %v2478_v17 = vpop.f32.mrb[27].mxu1 }
0x1a47   :  { %2654 = vtanh.f32 %v1508_v29  ;;  %v1509_v20 = vmul.f32 %v1507_v16, %v2995_v49 }
0x1a49   :  { %2656 = vtanh.f32 %v1509_v20 }
0x1a4a   :  { %2658 = vtanh.f32 %v1042_v37 }
0x1a51   :  { %v2655_v22 = vpop.eup %2654 }
0x1a52   :  { %v1512_v28 = vmul.f32 %v2655_v22, %v2995_v49 }
0x1a53   :  { %v2657_v23 = vpop.eup %2656 }
0x1a54   :  { %v1514_v45 = vadd.f32 %v1512_v28, %v3001_v60  ;;  %v1513_v27 = vmul.f32 %v2657_v23, %v2995_v49  ;;  %v2659_v57 = vpop.eup %2658 }
0x1a55   :  { %v1046_v59 = vmul.f32 %v2659_v57, %v2995_v49 }
0x1a56   :  { %1520 = vrot.lane.b32.xlu1 %v1514_v45, %s2782_s8  ;;  %v1515_v25 = vadd.f32 %v1513_v27, %v3001_v60  ;;  %v1516_v40 = vmul.f32 %v1514_v45, %v1442_v52 }
0x1a57   :  { %v3311_v36 = vadd.f32 %v1046_v59, %v3001_v60 }
0x1a58   :  { %1522 = vrot.lane.b32.xlu0 %v1515_v25, %s2782_s8  ;;  %v1517_v47 = vmul.f32 %v1515_v25, %v1443_v55 }
0x1a59   :  { %v1050_v27 = vmul.f32 %v3311_v36, %v3186_v34 }
0x1ac8   :  { %v1521_v30 = vpop.permute.xlu1 %1520 }
0x1ac9   :  { %v1526_v32 = vmul.f32 %v1521_v30, %v1514_v45 }
0x1aca   :  { %v1523_v33 = vpop.permute.xlu0 %1522 }
0x1acb   :  { %v1527_v35 = vmul.f32 %v1523_v33, %v1515_v25  ;;  %1530 = vrot.lane.b32.xlu1 %v1526_v32, %s2789_s3 }
0x1acd   :  { %1532 = vrot.lane.b32.xlu0 %v1527_v35, %s2789_s3 }
0x1b3d   :  { %v1531_v42 = vpop.permute.xlu1 %1530 }
0x1b3e   :  { %v3301_v12 = vadd.f32 %v1531_v42, %v1516_v40 }
0x1b3f   :  { %v1533_v48 = vpop.permute.xlu0 %1532 }
0x1b40   :  { %2660 = vtanh.f32 %v3301_v12  ;;  %v3304_v31 = vadd.f32 %v1533_v48, %v1517_v47 }
0x1b42   :  { %2662 = vtanh.f32 %v3304_v31 }
0x1b43   :  { %2664 = vtanh.f32 %v1043_v50 }
0x1b4a   :  { %v2661_v39 = vpop.eup %2660 }
0x1b4b   :  { %1542 = vrot.lane.b32.xlu1 %v2661_v39, %s2782_s8 }
0x1b4c   :  { %v2663_v38 = vpop.eup %2662 }
0x1b4d   :  { %1544 = vrot.lane.b32.xlu0 %v2663_v38, %s2782_s8  ;;  %v2665_v43 = vpop.eup %2664 }
0x1b4e   :  { %v1047_v54 = vmul.f32 %v2665_v43, %v2995_v49 }
0x1b50   :  { %v3320_v55 = vadd.f32 %v1047_v54, %v3001_v60 }
0x1b51   :  { %1054 = vrot.lane.b32.xlu0 %v3311_v36, %s2782_s8 }
0x1b52   :  { %v1051_v32 = vmul.f32 %v3320_v55, %v3190_v19 }
0x1bbd   :  { %v1543_v51 = vpop.permute.xlu1 %1542 }
0x1bbe   :  { %v1548_v18 = vmul.f32 %v1543_v51, %v1514_v45 }
0x1bbf   :  { %v1545_v15 = vpop.permute.xlu0 %1544 }
0x1bc0   :  { %v1549_v52 = vmul.f32 %v1545_v15, %v1515_v25 }
0x1bc2   :  { %v1552_v53 = vpack.c.bf16 %v1549_v52, %v1548_v18 }
0x1bc3   :  { %v1055_v2 = vpop.permute.xlu0 %1054 }
0x1bc4   :  { %1554 = vrot.lane.b32.xlu1 %v1552_v53, %s2789_s3  ;;  %v1060_v17 = vmul.f32 %v1055_v2, %v3311_v36 }
0x1bc8   :  { %1056 = vrot.lane.b32.xlu1 %v3320_v55, %s2782_s8 }
0x1c36   :  { %v1555_v56 = vpop.permute.xlu1 %1554 }
0x1c37   :  { %2484 = vmatmul.mubr.msk.bf16.vlgmr.msra.gmra.mrb[28].mxu1 %vm310_vm5, %v1555_v56 }
0x1c38   :  { %2496 = vmatpush3.bf16.msra.mxu1 %v3198_v24  ;;  %2499 = vmatprep.mubr.msk.bf16.mxu1 %vm2786_vm0, %v2785_v0 }
0x1c39   :  { %2497 = vmatprep.subr.bf16.mxu1 %v2785_v0 }
0x1c3a   :  { %v1057_v16 = vpop.permute.xlu1 %1056 }
0x1c3b   :  { %v1061_v20 = vmul.f32 %v1057_v16, %v3320_v55 }
0x1c3c   :  { %2498 = vmatpush3.bf16.msra.mxu1 %v3205_v26 }
0x1c3d   :  { %2511 = vmatprep.subr.bf16.mxu1 %v2785_v0 }
0x1d0a   :  { %v1593_v58 = vpop.f32.mrb[28].mxu1 }
0x1d0b   :  { %v1600_v41 = vadd.f32 %v1593_v58, %v1205_v44  ;;  %v2485_v63 = vpop.f32.mrb[29].mxu1 }
0x1d0c   :  { %v1596_v1 = vpop.f32.mrb[30].mxu1 }
0x1d0d   :  { %v1602_v3 = vmul.f32 %v1600_v41, %v2995_v49  ;;  %v1601_v21 = vadd.f32 %v1596_v1, %v1208_v61  ;;  %v2486_v5 = vpop.f32.mrb[31].mxu1  ;;  %v1213_v41 = vadd.f32 %v3235_v46, %v3177_v8  ;;  %v1216_v1 = vadd.f32 %v3235_v46, %v3181_v4 }
0x1d0f   :  { %2666 = vtanh.f32 %v1602_v3  ;;  %v1603_v10 = vmul.f32 %v1601_v21, %v2995_v49 }
0x1d11   :  { %2668 = vtanh.f32 %v1603_v10 }
0x1d19   :  { %v2667_v11 = vpop.eup %2666 }
0x1d1a   :  { %v1606_v6 = vmul.f32 %v2667_v11, %v2995_v49 }
0x1d1b   :  { %v2669_v13 = vpop.eup %2668 }
0x1d1c   :  { %v1608_v62 = vadd.f32 %v1606_v6, %v3001_v60  ;;  %v1607_v14 = vmul.f32 %v2669_v13, %v2995_v49 }
0x1d1e   :  { %1614 = vrot.lane.b32.xlu0 %v1608_v62, %s2782_s8  ;;  %v1609_v29 = vadd.f32 %v1607_v14, %v3001_v60  ;;  %v1610_v42 = vmul.f32 %v1608_v62, %v3301_v12 }
0x1d20   :  { %1616 = vrot.lane.b32.xlu1 %v1609_v29, %s2782_s8  ;;  %v1611_v48 = vmul.f32 %v1609_v29, %v3304_v31 }
0x1d22   :  { %1064 = vrot.lane.b32.xlu0 %v1060_v17, %s2789_s3 }
0x1d24   :  { %1066 = vrot.lane.b32.xlu1 %v1061_v20, %s2789_s3 }
0x1d90   :  { %v1615_v22 = vpop.permute.xlu0 %1614 }
0x1d91   :  { %v1620_v28 = vmul.f32 %v1615_v22, %v1608_v62 }
0x1d92   :  { %v1617_v23 = vpop.permute.xlu1 %1616 }
0x1d93   :  { %v1621_v45 = vmul.f32 %v1617_v23, %v1609_v29  ;;  %1624 = vrot.lane.b32.xlu0 %v1620_v28, %s2789_s3 }
0x1d94   :  { %v1065_v25 = vpop.permute.xlu0 %1064 }
0x1d95   :  { %v1070_v30 = vadd.f32 %v1065_v25, %v1050_v27  ;;  %1626 = vrot.lane.b32.xlu1 %v1621_v45, %s2789_s3 }
0x1d96   :  { %v1067_v33 = vpop.permute.xlu1 %1066 }
0x1d97   :  { %2670 = vtanh.f32 %v1070_v30  ;;  %v1071_v35 = vadd.f32 %v1067_v33, %v1051_v32 }
0x1d99   :  { %2672 = vtanh.f32 %v1071_v35 }
0x1da1   :  { %v2671_v37 = vpop.eup %2670 }
0x1da2   :  { %1076 = vrot.lane.b32.xlu0 %v2671_v37, %s2782_s8 }
0x1da3   :  { %v2673_v40 = vpop.eup %2672 }
0x1da4   :  { %1078 = vrot.lane.b32.xlu1 %v2673_v40, %s2782_s8 }
0x1e05   :  { %v1625_v34 = vpop.permute.xlu0 %1624 }
0x1e06   :  { %v3356_v47 = vadd.f32 %v1625_v34, %v1610_v42 }
0x1e07   :  { %v1627_v57 = vpop.permute.xlu1 %1626 }
0x1e08   :  { %2674 = vtanh.f32 %v3356_v47  ;;  %v3360_v19 = vadd.f32 %v1627_v57, %v1611_v48  ;;  %v1221_v48 = vadd.f32 %v3175_v7, %v3235_v46 }
0x1e0a   :  { %2676 = vtanh.f32 %v3360_v19 }
0x1e12   :  { %v2675_v39 = vpop.eup %2674 }
0x1e13   :  { %1636 = vrot.lane.b32.xlu0 %v2675_v39, %s2782_s8 }
0x1e14   :  { %v2677_v59 = vpop.eup %2676  ;;  %v1077_v38 = vpop.permute.xlu0 %1076 }
0x1e15   :  { %1638 = vrot.lane.b32.xlu1 %v2677_v59, %s2782_s8  ;;  %v1082_v50 = vmul.f32 %v1077_v38, %v3311_v36 }
0x1e16   :  { %v1079_v12 = vpop.permute.xlu1 %1078 }
0x1e17   :  { %v1083_v51 = vmul.f32 %v1079_v12, %v3320_v55 }
0x1e19   :  { %v1084_v31 = vpack.c.bf16 %v1083_v51, %v1082_v50 }
0x1e1b   :  { %1086 = vrot.lane.b32.xlu0 %v1084_v31, %s2789_s3 }
0x1e85   :  { %v1637_v43 = vpop.permute.xlu0 %1636 }
0x1e86   :  { %v1642_v18 = vmul.f32 %v1637_v43, %v1608_v62 }
0x1e87   :  { %v1639_v15 = vpop.permute.xlu1 %1638 }
0x1e88   :  { %v1643_v52 = vmul.f32 %v1639_v15, %v1609_v29 }
0x1e8a   :  { %v1646_v53 = vpack.c.bf16 %v1643_v52, %v1642_v18 }
0x1e8c   :  { %1648 = vrot.lane.b32.xlu1 %v1646_v53, %s2789_s3 }
0x1e8d   :  { %v1087_v54 = vpop.permute.xlu0 %1086 }
0x1e8e   :  { %1090 = vst.msk [vmem:[#allocation2 + $0x38] sm:$0xff] %vm310_vm5, %v1087_v54 }
0x1e95   :  { %v1098_v56 = vld [vmem:[#allocation2 + $0x38] sm:$0xff] }
0x1e96   :  { %2452 = vmatmul.mubr.msk.bf16.gmra.mrb[44].mxu0 %vm310_vm5, %v1098_v56 }
0x1e97   :  { %2491 = vmatprep.mubr.msk.bf16.mxu0 %vm2786_vm0, %v2785_v0 }
0x1efe   :  { %v1649_v36 = vpop.permute.xlu1 %1648 }
0x1eff   :  { %2492 = vmatmul.mubr.msk.bf16.vlgmr.msra.gmra.mrb[48].mxu0 %vm310_vm5, %v1649_v36 }
0x1f00   :  { %2504 = vmatpush3.bf16.msra.mxu0 %v3198_v24  ;;  %2507 = vmatprep.mubr.msk.bf16.mxu0 %vm2786_vm0, %v2785_v0 }
0x1f01   :  { %2505 = vmatprep.subr.bf16.mxu0 %v2785_v0 }
0x1f04   :  { %2506 = vmatpush3.bf16.msra.mxu0 %v3205_v26 }
0x1f05   :  { %2519 = vmatprep.subr.bf16.mxu0 %v2785_v0 }
0x1f69   :  { %v3380_v55 = vpop.f32.mrb[44].mxu0 }
0x1f6a   :  { %v3382_v44 = vpop.f32.mrb[45].mxu0 }
0x1f6b   :  { %v3384_v58 = vpop.f32.mrb[46].mxu0 }
0x1f6c   :  { %v3386_v61 = vpop.f32.mrb[47].mxu0 }
0x1fd2   :  { %v1687_v63 = vpop.f32.mrb[48].mxu0 }
0x1fd3   :  { %v1694_v3 = vadd.f32 %v1687_v63, %v1213_v41  ;;  %v2493_v21 = vpop.f32.mrb[49].mxu0 }
0x1fd4   :  { %v1690_v5 = vpop.f32.mrb[50].mxu0 }
0x1fd5   :  { %v1696_v10 = vmul.f32 %v1694_v3, %v2995_v49  ;;  %v1695_v11 = vadd.f32 %v1690_v5, %v1216_v1  ;;  %v2494_v6 = vpop.f32.mrb[51].mxu0 }
0x1fd7   :  { %2678 = vtanh.f32 %v1696_v10  ;;  %v1697_v13 = vmul.f32 %v1695_v11, %v2995_v49 }
0x1fd9   :  { %2680 = vtanh.f32 %v1697_v13 }
0x1fe1   :  { %v2679_v62 = vpop.eup %2678 }
0x1fe2   :  { %v1700_v14 = vmul.f32 %v2679_v62, %v2995_v49 }
0x1fe3   :  { %v2681_v2 = vpop.eup %2680 }
0x1fe4   :  { %v1702_v8 = vadd.f32 %v1700_v14, %v3001_v60  ;;  %v1701_v29 = vmul.f32 %v2681_v2, %v2995_v49  ;;  %v1229_v2 = vadd.f32 %v3235_v46, %v3382_v44 }
0x1fe6   :  { %1708 = vrot.lane.b32.xlu0 %v1702_v8, %s2782_s8  ;;  %v1703_v4 = vadd.f32 %v1701_v29, %v3001_v60  ;;  %v1704_v28 = vmul.f32 %v1702_v8, %v3356_v47  ;;  %v1232_v29 = vadd.f32 %v3235_v46, %v3386_v61 }
0x1fe8   :  { %1710 = vrot.lane.b32.xlu1 %v1703_v4, %s2782_s8  ;;  %v1705_v27 = vmul.f32 %v1703_v4, %v3360_v19  ;;  %v1224_v19 = vadd.f32 %v3179_v9, %v3235_v46 }
0x2058   :  { %v1709_v16 = vpop.permute.xlu0 %1708 }
0x2059   :  { %v1714_v17 = vmul.f32 %v1709_v16, %v1702_v8 }
0x205a   :  { %v1711_v20 = vpop.permute.xlu1 %1710 }
0x205b   :  { %v1715_v22 = vmul.f32 %v1711_v20, %v1703_v4  ;;  %1718 = vrot.lane.b32.xlu0 %v1714_v17, %s2789_s3 }
0x205d   :  { %1720 = vrot.lane.b32.xlu1 %v1715_v22, %s2789_s3 }
0x20cd   :  { %v1719_v23 = vpop.permute.xlu0 %1718 }
0x20ce   :  { %v1724_v45 = vadd.f32 %v1719_v23, %v1704_v28 }
0x20cf   :  { %v1721_v25 = vpop.permute.xlu1 %1720 }
0x20d0   :  { %2682 = vtanh.f32 %v1724_v45  ;;  %v1725_v30 = vadd.f32 %v1721_v25, %v1705_v27 }
0x20d2   :  { %2684 = vtanh.f32 %v1725_v30 }
0x20da   :  { %v2683_v32 = vpop.eup %2682 }
0x20db   :  { %1730 = vrot.lane.b32.xlu0 %v2683_v32, %s2782_s8 }
0x20dc   :  { %v2685_v33 = vpop.eup %2684 }
0x20dd   :  { %1732 = vrot.lane.b32.xlu1 %v2685_v33, %s2782_s8 }
0x214d   :  { %v1731_v35 = vpop.permute.xlu0 %1730 }
0x214e   :  { %v1736_v40 = vmul.f32 %v1731_v35, %v1702_v8 }
0x214f   :  { %v1733_v37 = vpop.permute.xlu1 %1732 }
0x2150   :  { %v1737_v42 = vmul.f32 %v1733_v37, %v1703_v4 }
0x2152   :  { %v1740_v34 = vpack.c.bf16 %v1737_v42, %v1736_v40 }
0x2154   :  { %1742 = vrot.lane.b32.xlu0 %v1740_v34, %s2789_s3 }
0x21c6   :  { %v1743_v47 = vpop.permute.xlu0 %1742 }
0x21c7   :  { %2500 = vmatmul.mubr.msk.bf16.vlgmr.msra.gmra.mrb[32].mxu1 %vm310_vm5, %v1743_v47 }
0x21c8   :  { %2512 = vmatpush3.bf16.msra.mxu1 %v3198_v24  ;;  %2515 = vmatprep.mubr.msk.bf16.mxu1 %vm2786_vm0, %v2785_v0 }
0x21c9   :  { %2513 = vmatprep.subr.bf16.mxu1 %v2785_v0 }
0x21cc   :  { %2514 = vmatpush3.bf16.msra.mxu1 %v3205_v26 }
0x21cd   :  { %2527 = vmatprep.subr.bf16.mxu1 %v2785_v0 }
0x229a   :  { %v1781_v57 = vpop.f32.mrb[32].mxu1 }
0x229b   :  { %v1788_v39 = vadd.f32 %v1781_v57, %v1221_v48  ;;  %v2501_v59 = vpop.f32.mrb[33].mxu1 }
0x229c   :  { %v1784_v38 = vpop.f32.mrb[34].mxu1 }
0x229d   :  { %v1790_v24 = vmul.f32 %v1788_v39, %v2995_v49  ;;  %v1789_v12 = vadd.f32 %v1784_v38, %v1224_v19  ;;  %v2502_v50 = vpop.f32.mrb[35].mxu1 }
0x229f   :  { %2686 = vtanh.f32 %v1790_v24  ;;  %v1791_v51 = vmul.f32 %v1789_v12, %v2995_v49 }
0x22a1   :  { %2688 = vtanh.f32 %v1791_v51 }
0x22a9   :  { %v2687_v26 = vpop.eup %2686 }
0x22aa   :  { %v1794_v31 = vmul.f32 %v2687_v26, %v2995_v49  ;;  %v1237_v26 = vadd.f32 %v3380_v55, %v3235_v46 }
0x22ab   :  { %v2689_v43 = vpop.eup %2688 }
0x22ac   :  { %v1796_v7 = vadd.f32 %v1794_v31, %v3001_v60  ;;  %v1795_v15 = vmul.f32 %v2689_v43, %v2995_v49  ;;  %v1240_v43 = vadd.f32 %v3384_v58, %v3235_v46 }
0x22ae   :  { %1802 = vrot.lane.b32.xlu1 %v1796_v7, %s2782_s8  ;;  %v1797_v9 = vadd.f32 %v1795_v15, %v3001_v60  ;;  %v1798_v56 = vmul.f32 %v1796_v7, %v1724_v45 }
0x22b0   :  { %1804 = vrot.lane.b32.xlu0 %v1797_v9, %s2782_s8  ;;  %v1799_v63 = vmul.f32 %v1797_v9, %v1725_v30 }
0x2320   :  { %v1803_v18 = vpop.permute.xlu1 %1802 }
0x2321   :  { %v1808_v52 = vmul.f32 %v1803_v18, %v1796_v7 }
0x2322   :  { %v1805_v53 = vpop.permute.xlu0 %1804 }
0x2323   :  { %v1809_v54 = vmul.f32 %v1805_v53, %v1797_v9  ;;  %1812 = vrot.lane.b32.xlu1 %v1808_v52, %s2789_s3 }
0x2325   :  { %1814 = vrot.lane.b32.xlu0 %v1809_v54, %s2789_s3 }
0x2395   :  { %v1813_v36 = vpop.permute.xlu1 %1812 }
0x2396   :  { %v1818_v41 = vadd.f32 %v1813_v36, %v1798_v56 }
0x2397   :  { %v1815_v1 = vpop.permute.xlu0 %1814 }
0x2398   :  { %2690 = vtanh.f32 %v1818_v41  ;;  %v1819_v3 = vadd.f32 %v1815_v1, %v1799_v63 }
0x239a   :  { %2692 = vtanh.f32 %v1819_v3 }
0x23a2   :  { %v2691_v21 = vpop.eup %2690 }
0x23a3   :  { %1824 = vrot.lane.b32.xlu1 %v2691_v21, %s2782_s8 }
0x23a4   :  { %v2693_v5 = vpop.eup %2692 }
0x23a5   :  { %1826 = vrot.lane.b32.xlu0 %v2693_v5, %s2782_s8 }
0x2415   :  { %v1825_v10 = vpop.permute.xlu1 %1824 }
0x2416   :  { %v1830_v6 = vmul.f32 %v1825_v10, %v1796_v7 }
0x2417   :  { %v1827_v11 = vpop.permute.xlu0 %1826 }
0x2418   :  { %v1831_v13 = vmul.f32 %v1827_v11, %v1797_v9 }
0x241a   :  { %v1834_v62 = vpack.c.bf16 %v1831_v13, %v1830_v6 }
0x241c   :  { %1836 = vrot.lane.b32.xlu1 %v1834_v62, %s2789_s3  ;;  %v2573_v62 = vld [vmem:[%s3523_s7 + $0x8] sm:$0xff]  }
0x248e   :  { %v1837_v14 = vpop.permute.xlu1 %1836 }
0x248f   :  { %2508 = vmatmul.mubr.msk.bf16.vlgmr.msra.gmra.mrb[52].mxu0 %vm310_vm5, %v1837_v14 }
0x2490   :  { %2523 = vmatprep.mubr.msk.bf16.mxu0 %vm2786_vm0, %v2785_v0 }
0x2562   :  { %v1875_v8 = vpop.f32.mrb[52].mxu0 }
0x2563   :  { %v1882_v4 = vadd.f32 %v1875_v8, %v1229_v2  ;;  %v2509_v16 = vpop.f32.mrb[53].mxu0  ;;  %v2574_v8 = vld [vmem:[%s3525_s9] sm:$0xff]  }
0x2564   :  { %v1878_v17 = vpop.f32.mrb[54].mxu0  ;;  %v2576_v16 = vld [vmem:[%s3525_s9 + $0x10] sm:$0xff]  }
0x2565   :  { %v1884_v20 = vmul.f32 %v1882_v4, %v2995_v49  ;;  %v1883_v22 = vadd.f32 %v1878_v17, %v1232_v29  ;;  %v2510_v28 = vpop.f32.mrb[55].mxu0  ;;  %v2575_v29 = vld [vmem:[%s3525_s9 + $0x8] sm:$0xff]  }
0x2566   :  { %v2577_v28 = vld [vmem:[%s3525_s9 + $0x18] sm:$0xff]  }
0x2567   :  { %2694 = vtanh.f32 %v1884_v20  ;;  %v1885_v23 = vmul.f32 %v1883_v22, %v2995_v49 }
0x2569   :  { %2696 = vtanh.f32 %v1885_v23 }
0x2571   :  { %v2695_v45 = vpop.eup %2694 }
0x2572   :  { %v1888_v27 = vmul.f32 %v2695_v45, %v2995_v49  ;;  %v2578_v45 = vld [vmem:[%s3525_s9 + $0x20] sm:$0xff]  }
0x2573   :  { %v2697_v25 = vpop.eup %2696 }
0x2574   :  { %v1890_v44 = vadd.f32 %v1888_v27, %v3001_v60  ;;  %v1889_v30 = vmul.f32 %v2697_v25, %v2995_v49  ;;  %v2579_v27 = vld [vmem:[%s3525_s9 + $0x28] sm:$0xff]  }
0x2576   :  { %1896 = vrot.lane.b32.xlu0 %v1890_v44, %s2782_s8  ;;  %v1891_v61 = vadd.f32 %v1889_v30, %v3001_v60  ;;  %v1892_v40 = vmul.f32 %v1890_v44, %v1818_v41  ;;  %v2581_v30 = vld [vmem:[%s3525_s9 + $0x38] sm:$0xff]  }
0x2578   :  { %1898 = vrot.lane.b32.xlu1 %v1891_v61, %s2782_s8  ;;  %v1893_v47 = vmul.f32 %v1891_v61, %v1819_v3 }
0x25e8   :  { %v1897_v32 = vpop.permute.xlu0 %1896 }
0x25e9   :  { %v1902_v33 = vmul.f32 %v1897_v32, %v1890_v44 }
0x25ea   :  { %v1899_v35 = vpop.permute.xlu1 %1898 }
0x25eb   :  { %v1903_v37 = vmul.f32 %v1899_v35, %v1891_v61  ;;  %1906 = vrot.lane.b32.xlu0 %v1902_v33, %s2789_s3 }
0x25ed   :  { %1908 = vrot.lane.b32.xlu1 %v1903_v37, %s2789_s3 }
0x265d   :  { %v1907_v42 = vpop.permute.xlu0 %1906 }
0x265e   :  { %v1912_v34 = vadd.f32 %v1907_v42, %v1892_v40 }
0x265f   :  { %v1909_v48 = vpop.permute.xlu1 %1908 }
0x2660   :  { %2698 = vtanh.f32 %v1912_v34  ;;  %v1913_v57 = vadd.f32 %v1909_v48, %v1893_v47 }
0x2662   :  { %2700 = vtanh.f32 %v1913_v57 }
0x266a   :  { %v2699_v19 = vpop.eup %2698 }
0x266b   :  { %1918 = vrot.lane.b32.xlu0 %v2699_v19, %s2782_s8 }
0x266c   :  { %v2701_v39 = vpop.eup %2700 }
0x266d   :  { %1920 = vrot.lane.b32.xlu1 %v2701_v39, %s2782_s8 }
0x26dd   :  { %v1919_v59 = vpop.permute.xlu0 %1918 }
0x26de   :  { %v1924_v24 = vmul.f32 %v1919_v59, %v1890_v44  ;;  %v2580_v44 = vld [vmem:[%s3525_s9 + $0x30] sm:$0xff]  }
0x26df   :  { %v1921_v38 = vpop.permute.xlu1 %1920 }
0x26e0   :  { %v1925_v12 = vmul.f32 %v1921_v38, %v1891_v61  ;;  %v2261_v61 = vld [vmem:[#allocation6] ss:$0 sm:$0xff] }
0x26e2   :  { %v1928_v50 = vpack.c.bf16 %v1925_v12, %v1924_v24 }
0x26e4   :  { %1930 = vrot.lane.b32.xlu0 %v1928_v50, %s2789_s3 }
0x2756   :  { %v1931_v51 = vpop.permute.xlu0 %1930 }
0x2757   :  { %2516 = vmatmul.mubr.msk.bf16.vlgmr.msra.gmra.mrb[36].mxu1 %vm310_vm5, %v1931_v51 }
0x2758   :  { %2543 = vmatprep.mubr.msk.bf16.mxu1 %vm2786_vm0, %v2785_v0  ;;  %2528 = vmatpush3.bf16.msra.mxu1 %v2574_v8 }
0x2759   :  { %2529 = vmatprep.subr.bf16.mxu1 %v2785_v0 }
0x275c   :  { %2530 = vmatpush3.bf16.msra.mxu1 %v2575_v29 }
0x275d   :  { %2531 = vmatprep.subr.bf16.mxu1 %v2785_v0 }
0x2760   :  { %2532 = vmatpush3.bf16.msra.mxu1 %v2576_v16 }
0x2761   :  { %2533 = vmatprep.subr.bf16.mxu1 %v2785_v0 }
0x2764   :  { %2534 = vmatpush3.bf16.msra.mxu1 %v2577_v28 }
0x2765   :  { %2535 = vmatprep.subr.bf16.mxu1 %v2785_v0 }
0x2768   :  { %2536 = vmatpush3.bf16.msra.mxu1 %v2578_v45 }
0x2769   :  { %2537 = vmatprep.subr.bf16.mxu1 %v2785_v0 }
0x276c   :  { %2538 = vmatpush3.bf16.msra.mxu1 %v2579_v27 }
0x276d   :  { %2539 = vmatprep.subr.bf16.mxu1 %v2785_v0 }
0x2770   :  { %2540 = vmatpush3.bf16.msra.mxu1 %v2580_v44 }
0x2771   :  { %2541 = vmatprep.subr.bf16.mxu1 %v2785_v0 }
0x2774   :  { %2542 = vmatpush3.bf16.msra.mxu1 %v2581_v30 }
0x282a   :  { %v1969_v31 = vpop.f32.mrb[36].mxu1 }
0x282b   :  { %v1976_v7 = vadd.f32 %v1969_v31, %v1237_v26  ;;  %v2517_v15 = vpop.f32.mrb[37].mxu1 }
0x282c   :  { %v1972_v9 = vpop.f32.mrb[38].mxu1 }
0x282d   :  { %v1978_v18 = vmul.f32 %v1976_v7, %v2995_v49  ;;  %v1977_v52 = vadd.f32 %v1972_v9, %v1240_v43  ;;  %v2518_v53 = vpop.f32.mrb[39].mxu1 }
0x282f   :  { %2702 = vtanh.f32 %v1978_v18  ;;  %v1979_v54 = vmul.f32 %v1977_v52, %v2995_v49 }
0x2831   :  { %2704 = vtanh.f32 %v1979_v54 }
0x2839   :  { %v2703_v56 = vpop.eup %2702 }
0x283a   :  { %v1982_v36 = vmul.f32 %v2703_v56, %v2995_v49 }
0x283b   :  { %v2705_v41 = vpop.eup %2704 }
0x283c   :  { %v1984_v55 = vadd.f32 %v1982_v36, %v3001_v60  ;;  %v1983_v63 = vmul.f32 %v2705_v41, %v2995_v49 }
0x283e   :  { %1990 = vrot.lane.b32.xlu1 %v1984_v55, %s2782_s8  ;;  %v1985_v46 = vadd.f32 %v1983_v63, %v3001_v60  ;;  %v1986_v5 = vmul.f32 %v1984_v55, %v1912_v34  ;;  %v2572_v60 = vld [vmem:[%s3523_s7] sm:$0xff]  }
0x283f   :  { %2520 = vmatpush3.bf16.msra.mxu0 %v2572_v60 }
0x2840   :  { %1992 = vrot.lane.b32.xlu0 %v1985_v46, %s2782_s8  ;;  %v1987_v6 = vmul.f32 %v1985_v46, %v1913_v57  ;;  %2521 = vmatprep.subr.bf16.mxu0 %v2785_v0  ;;  %v2265_v57 = vld [vmem:[#allocation8] ss:$0 sm:$0xff] }
0x2843   :  { %2522 = vmatpush3.bf16.msra.mxu0 %v2573_v62 }
0x28b0   :  { %v1991_v58 = vpop.permute.xlu1 %1990 }
0x28b1   :  { %v1996_v1 = vmul.f32 %v1991_v58, %v1984_v55 }
0x28b2   :  { %v1993_v3 = vpop.permute.xlu0 %1992 }
0x28b3   :  { %v1997_v21 = vmul.f32 %v1993_v3, %v1985_v46  ;;  %2000 = vrot.lane.b32.xlu1 %v1996_v1, %s2789_s3 }
0x28b5   :  { %2002 = vrot.lane.b32.xlu0 %v1997_v21, %s2789_s3 }
0x2925   :  { %v2001_v10 = vpop.permute.xlu1 %2000 }
0x2926   :  { %v2006_v11 = vadd.f32 %v2001_v10, %v1986_v5 }
0x2927   :  { %v2003_v13 = vpop.permute.xlu0 %2002 }
0x2928   :  { %2706 = vtanh.f32 %v2006_v11  ;;  %v2007_v49 = vadd.f32 %v2003_v13, %v1987_v6 }
0x292a   :  { %2708 = vtanh.f32 %v2007_v49 }
0x2932   :  { %v2707_v14 = vpop.eup %2706 }
0x2933   :  { %2012 = vrot.lane.b32.xlu1 %v2707_v14, %s2782_s8 }
0x2934   :  { %v2709_v2 = vpop.eup %2708 }
0x2935   :  { %2014 = vrot.lane.b32.xlu0 %v2709_v2, %s2782_s8 }
0x29a5   :  { %v2013_v4 = vpop.permute.xlu1 %2012 }
0x29a6   :  { %v2018_v20 = vmul.f32 %v2013_v4, %v1984_v55 }
0x29a7   :  { %v2015_v17 = vpop.permute.xlu0 %2014 }
0x29a8   :  { %v2019_v22 = vmul.f32 %v2015_v17, %v1985_v46 }
0x29aa   :  { %v2020_v23 = vpack.c.bf16 %v2019_v22, %v2018_v20 }
0x29ac   :  { %2033 = vrot.lane.b32.xlu1 %v2020_v23, %s2789_s3 }
0x2a1e   :  { %v2034_v25 = vpop.permute.xlu1 %2033 }
0x2a1f   :  { %2524 = vmatmul.mubr.msk.bf16.vlgmr.msra.gmra.mrb[56].mxu0 %vm310_vm5, %v2034_v25 }
0x2af2   :  { %v2084_v32 = vpop.f32.mrb[56].mxu0 }
0x2af3   :  { %v2085_v33 = vadd.f32 %v2261_v61, %v2084_v32  ;;  %v2525_v35 = vpop.f32.mrb[57].mxu0 }
0x2af4   :  { %v2087_v37 = vpop.f32.mrb[58].mxu0 }
0x2af5   :  { %v2088_v40 = vadd.f32 %v2261_v61, %v2087_v37  ;;  %v2526_v42 = vpop.f32.mrb[59].mxu0  ;;  %v2091_v34 = vmax.f32 %v2085_v33, 0.0 }
0x2af7   :  { %v2092_v47 = vmax.f32 %v2088_v40, 0.0 }
0x2af9   :  { %v2093_v48 = vpack.c.bf16 %v2092_v47, %v2091_v34 }
0x2afb   :  { %2544 = vmatmul.mubr.bf16.vlgmr.msra.gmra.mrb[40].mxu1 %v2093_v48 }
0x2bce   :  { %v2199_v19 = vpop.f32.mrb[40].mxu1 }
0x2bcf   :  { %v2200_v39 = vadd.f32 %v2265_v57, %v2199_v19  ;;  %v2545_v0 = vpop.f32.mrb[41].mxu1 }
0x2bd0   :  { %v2202_v59 = vpop.f32.mrb[42].mxu1 }
0x2bd1   :  { %2206 = vst [vmem:[%s3527_s11] sm:$0xff] %v2200_v39  ;;  %v2203_v38 = vadd.f32 %v2265_v57, %v2202_v59  ;;  %v2546_v24 = vpop.f32.mrb[43].mxu1 }
0x2bd3   :  { %2207 = vst [vmem:[%s3527_s11 + $0x8] sm:$0xff] %v2203_v38 }
0x2bd4   :  { %2212 = vsyncpa [#allocation5], 1 }
0x2bd5   :  { %2213 = vsyncpa [#allocation7], 1 }

</bundles_post_ra>
